<compile_context>
chip_gen: v6e
topology: v6e:2x2x1
jax: 0.10.0
libtpu: 0.0.40
codegen_flags: <defaults>
</compile_context>

<pallas_src>
import jax
import jax.numpy as jnp
import numpy as np
from jax.experimental import pallas as pl
from jax.experimental.pallas import tpu as pltpu


# ----------------------------- Pallas kernel --------------------------------
def attention_kernel(lens_ref, q_ref, mem_ref, pmem_ref, awc_ref,
                     wq_ref, wfused_ref, v_ref,
                     ctx_ref, eng_ref, m_ref, l_ref):
    # lens_ref  : (Bb, 1)   int32   valid length per row (mask = pos >= len)
    # q_ref     : (Bb, rnn) f32
    # mem_ref   : (Bb, Tt, E)   stream dtype (bf16 or f32)
    # pmem_ref  : (Bb, Tt, A)   stream dtype
    # awc_ref   : (Bb, Tt, 2K)  stream dtype (im2col of attention_weights_cat)
    # wq_ref    : (rnn, A)  f32
    # wfused_ref: (2K, A)   f32   (conv weight fused with location_dense)
    # v_ref     : (1, A)    f32
    # ctx_ref   : (Bb, E)   f32   resident accumulator -> normalized at t==last
    # eng_ref   : (Bb, Tt)  f32   raw masked energies for this T chunk
    # m_ref     : (Bb, 1)   f32   running max     (resident over T axis)
    # l_ref     : (Bb, 1)   f32   running denom   (resident over T axis)
    Bb, Tt, twoK = awc_ref.shape
    A = pmem_ref.shape[-1]
    t_idx = pl.program_id(1)

    @pl.when(t_idx == 0)
    def _init():
        m_ref[...] = jnp.full_like(m_ref, -jnp.inf)
        l_ref[...] = jnp.zeros_like(l_ref)
        ctx_ref[...] = jnp.zeros_like(ctx_ref)

    # ---- query_layer: (Bb, rnn) @ (rnn, A)  (tiny; recomputed per chunk)
    pq = jnp.dot(q_ref[...], wq_ref[...], preferred_element_type=jnp.float32)

    # ---- fused location path: ONE tall matmul (Bb*Tt, 2K) @ (2K, A)
    awc2d = awc_ref[...].astype(jnp.float32).reshape(Bb * Tt, twoK)
    ploc = jnp.dot(awc2d, wfused_ref[...],
                   preferred_element_type=jnp.float32).reshape(Bb, Tt, A)

    # ---- energies = v . tanh(pq + ploc + pmem)   (VPU + lane reduce over A)
    e3 = jnp.tanh(pq[:, None, :] + ploc + pmem_ref[...].astype(jnp.float32))
    energies = jnp.sum(e3 * v_ref[...].reshape(1, 1, A), axis=-1)   # (Bb, Tt)

    # ---- masked_fill(mask, -inf) via lengths (mask built in-kernel)
    pos = jax.lax.broadcasted_iota(jnp.int32, (Bb, Tt), 1) + t_idx * Tt
    energies = jnp.where(pos >= lens_ref[...], jnp.float32(-jnp.inf), energies)

    # raw energies out (lane-dense (Bb, Tt) block; finalized in the wrapper)
    eng_ref[...] = energies

    # ---- online softmax + context accumulation (all f32)
    # NOTE: a fully padded row (length 0) yields NaN weights/context, matching
    # PyTorch softmax-over-all(-inf) semantics.
    m_prev = m_ref[...]
    m_new = jnp.maximum(m_prev, jnp.max(energies, axis=-1, keepdims=True))
    alpha = jnp.exp(m_prev - m_new)                                  # (Bb, 1)
    p = jnp.exp(energies - m_new)                                    # (Bb, Tt)
    l_ref[...] = alpha * l_ref[...] + jnp.sum(p, axis=-1, keepdims=True)
    ctx_ref[...] = alpha * ctx_ref[...] + jnp.sum(
        p[:, :, None] * mem_ref[...].astype(jnp.float32), axis=1)    # (Bb, E)
    m_ref[...] = m_new

    @pl.when(t_idx == pl.num_programs(1) - 1)
    def _finalize():
        ctx_ref[...] = ctx_ref[...] / l_ref[...]


# ------------------------------ wrapper --------------------------------------
def attention_forward(query, memory, processed_memory, attention_weights_cat,
                      lengths, wq, wconv, wloc, v, *,
                      batch_tile=None, t_tile=None,
                      stream_dtype=jnp.bfloat16,
                      vmem_limit_bytes=48 * 1024 * 1024):
    """Forward pass of Tacotron2 Attention.

    lengths: (B,) int32 valid encoder frames per row; the padding mask is
             positions >= length (exactly how Tacotron2 builds its mask).
    batch_tile: rows per grid step on the parallel axis (multiple of 8 when
             < B). On v7x keep B/batch_tile >= 2 so both TensorCores are used.
    t_tile:  encoder-frame chunk (multiple of 128) on the 'arbitrary' axis.
    stream_dtype: dtype of the big HBM streams (memory / processed_memory /
             im2col'd weights). Math inside the kernel stays f32.
    """
    B, T, E = memory.shape
    rnn_dim, A = wq.shape
    F_, c_in, K = wconv.shape
    assert c_in == 2 and K % 2 == 1, "Tacotron2 location conv: 2 channels, odd K"

    # ---- tiles -------------------------------------------------------------
    Bb = batch_tile if batch_tile is not None else (8 if B % 8 == 0 else B)
    assert B % Bb == 0, "batch_tile must divide B"
    if Bb != B:
        assert Bb % 8 == 0, "batch_tile must be a multiple of 8 (sublane rule)"

    if t_tile is None:
        Tt = min(256, ((T + 127) // 128) * 128)
    else:
        Tt = t_tile
    assert Tt % 128 == 0, "t_tile must be a multiple of 128 (lane rule)"
    nt = (T + Tt - 1) // Tt
    T_pad = nt * Tt
    pad_t = T_pad - T
    grid = (B // Bb, nt)

    # ---- wrapper-side layout plumbing (done once) ---------------------------
    pad_k = (K - 1) // 2
    awc = attention_weights_cat.astype(jnp.float32)                  # (B, 2, T)
    awc_pad = jnp.pad(awc, ((0, 0), (0, 0), (pad_k, pad_k + pad_t)))
    cols = jnp.stack([awc_pad[:, :, k:k + T_pad] for k in range(K)], axis=-1)
    awc_col = cols.transpose(0, 2, 1, 3).reshape(B, T_pad, 2 * K)    # (B,Tp,2K)
    # TODO(synk): build the 2K conv taps in-kernel with pltpu.roll on a
    # lane-dense (Bb, Tt) layout to avoid the K-fold im2col HBM blow-up at the
    # production kernel size (K=31); kept as a bf16 im2col stream here.

    wconv2d = wconv.reshape(F_, 2 * K).T                             # (2K, F)
    wfused = (wconv2d @ wloc).astype(jnp.float32)                    # (2K, A)
    v_row = v.reshape(1, A).astype(jnp.float32)
    lens32 = lengths.astype(jnp.int32).reshape(B, 1)

    mem_p = jnp.pad(memory, ((0, 0), (0, pad_t), (0, 0))).astype(stream_dtype)
    pmem_p = jnp.pad(processed_memory,
                     ((0, 0), (0, pad_t), (0, 0))).astype(stream_dtype)
    awc_s = awc_col.astype(stream_dtype)

    def rep2(shape):  # whole-array weight blocks, same every grid step
        return pl.BlockSpec(shape, lambda b, t: (0, 0))

    ctx, eng, m, l = pl.pallas_call(
        attention_kernel,
        out_shape=(jax.ShapeDtypeStruct((B, E), jnp.float32),
                   jax.ShapeDtypeStruct((B, T_pad), jnp.float32),
                   jax.ShapeDtypeStruct((B, 1), jnp.float32),
                   jax.ShapeDtypeStruct((B, 1), jnp.float32)),
        grid=grid,
        in_specs=[
            pl.BlockSpec((Bb, 1), lambda b, t: (b, 0)),              # lengths
            pl.BlockSpec((Bb, rnn_dim), lambda b, t: (b, 0)),        # query
            pl.BlockSpec((Bb, Tt, E), lambda b, t: (b, t, 0)),       # memory
            pl.BlockSpec((Bb, Tt, A), lambda b, t: (b, t, 0)),       # processed_memory
            pl.BlockSpec((Bb, Tt, 2 * K), lambda b, t: (b, t, 0)),   # awc im2col
            rep2((rnn_dim, A)),                                      # W_query
            rep2((2 * K, A)),                                        # W_fused
            rep2((1, A)),                                            # v
        ],
        out_specs=(pl.BlockSpec((Bb, E), lambda b, t: (b, 0)),       # ctx (resident)
                   pl.BlockSpec((Bb, Tt), lambda b, t: (b, t)),      # energies
                   pl.BlockSpec((Bb, 1), lambda b, t: (b, 0)),       # m (resident)
                   pl.BlockSpec((Bb, 1), lambda b, t: (b, 0))),      # l (resident)
        compiler_params=pltpu.CompilerParams(
            dimension_semantics=("parallel", "arbitrary"),
            vmem_limit_bytes=vmem_limit_bytes),
    )(lens32, query.astype(jnp.float32), mem_p, pmem_p, awc_s,
      wq.astype(jnp.float32), wfused, v_row)

    # Final element-wise softmax scale (negligible traffic; all reductions and
    # the context normalization were done in-kernel).
    attw = jnp.exp(eng - m) / l                                      # (B, T_pad)
    return ctx, attw[:, :T]


# ------------------------- pure-JAX reference --------------------------------
def attention_reference(query, memory, processed_memory, attention_weights_cat,
                        mask, wq, wconv, wloc, v):
    K = wconv.shape[-1]
    pad = (K - 1) // 2
    pq = query @ wq                                                   # (B, A)
    conv = jax.lax.conv_general_dilated(
        attention_weights_cat, wconv, window_strides=(1,),
        padding=[(pad, pad)], dimension_numbers=("NCH", "OIH", "NCH"))  # (B,F,T)
    ploc = jnp.einsum("bft,fa->bta", conv, wloc)                      # (B, T, A)
    e = jnp.tanh(pq[:, None, :] + ploc + processed_memory)            # (B, T, A)
    energies = jnp.einsum("bta,a->bt", e, v[:, 0])                    # (B, T)
    energies = jnp.where(mask, -jnp.inf, energies)
    w = jax.nn.softmax(energies, axis=1)
    ctx = jnp.einsum("bt,bte->be", w, memory)
    return ctx, w


# ----------------------------- param init ------------------------------------
def xavier_uniform(key, shape, fan_in, fan_out, gain=1.0):
    limit = gain * np.sqrt(6.0 / (fan_in + fan_out))
    return jax.random.uniform(key, shape, jnp.float32, -limit, limit)


if __name__ == "__main__":
    # Small config consistent with the module.
    B, T = 2, 16
    attention_rnn_dim = 32
    embedding_dim = 32
    attention_dim = 32
    attention_location_n_filters = 8
    attention_location_kernel_size = 5

    key = jax.random.PRNGKey(0)
    ks = jax.random.split(key, 9)
    gain_tanh = 5.0 / 3.0

    # linear weights stored as (in, out)
    wq = xavier_uniform(ks[0], (attention_rnn_dim, attention_dim),
                        attention_rnn_dim, attention_dim, gain_tanh)
    wmem = xavier_uniform(ks[1], (embedding_dim, attention_dim),
                          embedding_dim, attention_dim, gain_tanh)
    wloc = xavier_uniform(ks[2], (attention_location_n_filters, attention_dim),
                          attention_location_n_filters, attention_dim, gain_tanh)
    v = xavier_uniform(ks[3], (attention_dim, 1), attention_dim, 1, 1.0)
    # conv weight in PyTorch layout (out_channels, in_channels, K)
    wconv = xavier_uniform(ks[4],
                           (attention_location_n_filters, 2,
                            attention_location_kernel_size),
                           2 * attention_location_kernel_size,
                           attention_location_n_filters *
                           attention_location_kernel_size, 1.0)

    # inputs
    query = jax.random.normal(ks[5], (B, attention_rnn_dim), jnp.float32)
    memory = jax.random.normal(ks[6], (B, T, embedding_dim), jnp.float32)
    prev = jax.nn.softmax(jax.random.normal(ks[7], (B, T)), axis=-1)
    cum = jax.nn.softmax(jax.random.normal(ks[8], (B, T)), axis=-1)
    attention_weights_cat = jnp.stack([prev, cum], axis=1)            # (B, 2, T)

    # second row has 4 padded frames; mask = positions >= length
    lengths = jnp.array([T, T - 4], dtype=jnp.int32)
    mask = jnp.arange(T)[None, :] >= lengths[:, None]                 # (B, T)

    # processed_memory = memory_layer(memory) (precomputed, as in Tacotron2)
    processed_memory = jnp.einsum("bte,ea->bta", memory, wmem)

    # --- run 1: f32 streams, tight check against the f32 reference ----------
    ctx32, attw32 = attention_forward(query, memory, processed_memory,
                                      attention_weights_cat, lengths,
                                      wq, wconv, wloc, v,
                                      stream_dtype=jnp.float32)
    jax.block_until_ready((ctx32, attw32))
    ctx_ref, attw_ref = attention_reference(query, memory, processed_memory,
                                            attention_weights_cat, mask,
                                            wq, wconv, wloc, v)
    np.testing.assert_allclose(np.asarray(ctx32), np.asarray(ctx_ref),
                               rtol=1e-4, atol=1e-5)
    np.testing.assert_allclose(np.asarray(attw32), np.asarray(attw_ref),
                               rtol=1e-4, atol=1e-5)

    # --- run 2: bf16 streams (production default), matched-precision ref ----
    ctx16, attw16 = attention_forward(query, memory, processed_memory,
                                      attention_weights_cat, lengths,
                                      wq, wconv, wloc, v)             # bf16
    jax.block_until_ready((ctx16, attw16))
    bf = lambda x: x.astype(jnp.bfloat16).astype(jnp.float32)
    ctx_r16, attw_r16 = attention_reference(query, bf(memory),
                                            bf(processed_memory),
                                            bf(attention_weights_cat), mask,
                                            wq, wconv, wloc, v)
    np.testing.assert_allclose(np.asarray(ctx16), np.asarray(ctx_r16),
                               rtol=2e-3, atol=2e-3)
    np.testing.assert_allclose(np.asarray(attw16), np.asarray(attw_r16),
                               rtol=2e-3, atol=2e-3)

    print("KERNEL_OK")
</pallas_src>

<mosaic_0001>
module attributes {stable_mosaic.version = 11 : i64} {
  func.func @attention_kernel(%arg0: i32, %arg1: i32, %arg2: memref<2x1xi32, #tpu.memory_space<vmem>>, %arg3: memref<2x32xf32, #tpu.memory_space<vmem>>, %arg4: memref<2x128x32xf32, #tpu.memory_space<vmem>>, %arg5: memref<2x128x32xf32, #tpu.memory_space<vmem>>, %arg6: memref<2x128x10xf32, #tpu.memory_space<vmem>>, %arg7: memref<32x32xf32, #tpu.memory_space<vmem>>, %arg8: memref<10x32xf32, #tpu.memory_space<vmem>>, %arg9: memref<1x32xf32, #tpu.memory_space<vmem>>, %arg10: memref<2x32xf32, #tpu.memory_space<vmem>>, %arg11: memref<2x128xf32, #tpu.memory_space<vmem>>, %arg12: memref<2x1xf32, #tpu.memory_space<vmem>>, %arg13: memref<2x1xf32, #tpu.memory_space<vmem>>) attributes {dimension_semantics = [#tpu.dimension_semantics<parallel>, #tpu.dimension_semantics<arbitrary>], iteration_bounds = array<i64: 1, 1>, scalar_prefetch = 0 : i64, scratch_operands = 0 : i64, tpu.core_type = #tpu.core_type<tc>, window_params = [{transform_indices = @transform_0, window_bounds = array<i64: 2, 1>}, {transform_indices = @transform_1, window_bounds = array<i64: 2, 32>}, {transform_indices = @transform_2, window_bounds = array<i64: 2, 128, 32>}, {transform_indices = @transform_3, window_bounds = array<i64: 2, 128, 32>}, {transform_indices = @transform_4, window_bounds = array<i64: 2, 128, 10>}, {pipeline_mode = #tpu.pipeline_mode<synchronous>, transform_indices = @transform_5, window_bounds = array<i64: 32, 32>}, {pipeline_mode = #tpu.pipeline_mode<synchronous>, transform_indices = @transform_6, window_bounds = array<i64: 10, 32>}, {pipeline_mode = #tpu.pipeline_mode<synchronous>, transform_indices = @transform_7, window_bounds = array<i64: 1, 32>}, {transform_indices = @transform_8, window_bounds = array<i64: 2, 32>}, {transform_indices = @transform_9, window_bounds = array<i64: 2, 128>}, {transform_indices = @transform_10, window_bounds = array<i64: 2, 1>}, {transform_indices = @transform_11, window_bounds = array<i64: 2, 1>}]} {
    %c0_i32 = arith.constant 0 : i32
    %0 = arith.cmpi eq, %arg1, %c0_i32 : i32
    %1 = arith.extui %0 : i1 to i32
    %c0_i32_0 = arith.constant 0 : i32
    %2 = arith.cmpi ne, %1, %c0_i32_0 : i32
    scf.if %2 {
      %cst_41 = arith.constant 0xFF800000 : f32
      %61 = vector.broadcast %cst_41 : f32 to vector<2x1xf32>
      %c0_42 = arith.constant 0 : index
      %c0_43 = arith.constant 0 : index
      %62 = vector.load %arg12[%c0_42, %c0_43] : memref<2x1xf32, #tpu.memory_space<vmem>>, vector<2x1xf32>
      tpu.vector_store %arg12[%c0_42, %c0_43], %61 {strides = array<i32>} : memref<2x1xf32, #tpu.memory_space<vmem>>, vector<2x1xf32>,
      %cst_44 = arith.constant 0.000000e+00 : f32
      %63 = vector.broadcast %cst_44 : f32 to vector<2x1xf32>
      %c0_45 = arith.constant 0 : index
      %c0_46 = arith.constant 0 : index
      %64 = vector.load %arg13[%c0_45, %c0_46] : memref<2x1xf32, #tpu.memory_space<vmem>>, vector<2x1xf32>
      tpu.vector_store %arg13[%c0_45, %c0_46], %63 {strides = array<i32>} : memref<2x1xf32, #tpu.memory_space<vmem>>, vector<2x1xf32>,
      %cst_47 = arith.constant 0.000000e+00 : f32
      %65 = vector.broadcast %cst_47 : f32 to vector<2x32xf32>
      %c0_48 = arith.constant 0 : index
      %c0_49 = arith.constant 0 : index
      %66 = vector.load %arg10[%c0_48, %c0_49] : memref<2x32xf32, #tpu.memory_space<vmem>>, vector<2x32xf32>
      tpu.vector_store %arg10[%c0_48, %c0_49], %65 {strides = array<i32>} : memref<2x32xf32, #tpu.memory_space<vmem>>, vector<2x32xf32>,
    } else {
    }
    %c0 = arith.constant 0 : index
    %c0_1 = arith.constant 0 : index
    %3 = vector.load %arg3[%c0, %c0_1] : memref<2x32xf32, #tpu.memory_space<vmem>>, vector<2x32xf32>
    %c0_2 = arith.constant 0 : index
    %c0_3 = arith.constant 0 : index
    %4 = vector.load %arg7[%c0_2, %c0_3] : memref<32x32xf32, #tpu.memory_space<vmem>>, vector<32x32xf32>
    %cst = arith.constant dense<0.000000e+00> : vector<2x32xf32>
    %5 = tpu.matmul %3, %4, %cst {dimension_numbers = #tpu.dot_dimension_numbers<[1], [0], [0], [1], [0, 0, 1, 1], [], []>} : vector<2x32xf32>, vector<32x32xf32>, vector<2x32xf32> -> vector<2x32xf32>
    %c0_4 = arith.constant 0 : index
    %c0_5 = arith.constant 0 : index
    %c0_6 = arith.constant 0 : index
    %6 = vector.load %arg6[%c0_4, %c0_5, %c0_6] : memref<2x128x10xf32, #tpu.memory_space<vmem>>, vector<2x128x10xf32>
    %7 = vector.shape_cast %6 : vector<2x128x10xf32> to vector<256x10xf32>
    %c0_7 = arith.constant 0 : index
    %c0_8 = arith.constant 0 : index
    %8 = vector.load %arg8[%c0_7, %c0_8] : memref<10x32xf32, #tpu.memory_space<vmem>>, vector<10x32xf32>
    %cst_9 = arith.constant dense<0.000000e+00> : vector<256x32xf32>
    %9 = tpu.matmul %7, %8, %cst_9 {dimension_numbers = #tpu.dot_dimension_numbers<[1], [0], [0], [1], [0, 0, 1, 1], [], []>} : vector<256x10xf32>, vector<10x32xf32>, vector<256x32xf32> -> vector<256x32xf32>
    %10 = vector.shape_cast %9 : vector<256x32xf32> to vector<2x128x32xf32>
    %11 = vector.shape_cast %5 : vector<2x32xf32> to vector<2x1x32xf32>
    %12 = vector.broadcast %11 : vector<2x1x32xf32> to vector<2x128x32xf32>
    %13 = arith.addf %12, %10 : vector<2x128x32xf32>
    %c0_10 = arith.constant 0 : index
    %c0_11 = arith.constant 0 : index
    %c0_12 = arith.constant 0 : index
    %14 = vector.load %arg5[%c0_10, %c0_11, %c0_12] : memref<2x128x32xf32, #tpu.memory_space<vmem>>, vector<2x128x32xf32>
    %15 = arith.addf %13, %14 : vector<2x128x32xf32>
    %16 = math.tanh %15 : vector<2x128x32xf32>
    %c0_13 = arith.constant 0 : index
    %c0_14 = arith.constant 0 : index
    %17 = vector.load %arg9[%c0_13, %c0_14] : memref<1x32xf32, #tpu.memory_space<vmem>>, vector<1x32xf32>
    %18 = vector.shape_cast %17 : vector<1x32xf32> to vector<1x1x32xf32>
    %19 = vector.broadcast %18 : vector<1x1x32xf32> to vector<2x128x32xf32>
    %20 = arith.mulf %16, %19 : vector<2x128x32xf32>
    %cst_15 = arith.constant dense<0.000000e+00> : vector<2x128xf32>
    %21 = vector.multi_reduction <add>, %20, %cst_15 [2] : vector<2x128x32xf32> to vector<2x128xf32>
    %22 = tpu.iota {dimensions = array<i32: 1>} : vector<2x128xi32>
    %c128_i32 = arith.constant 128 : i32
    %23 = arith.muli %arg1, %c128_i32 : i32
    %24 = vector.broadcast %23 : i32 to vector<2x128xi32>
    %25 = arith.addi %22, %24 : vector<2x128xi32>
    %c0_16 = arith.constant 0 : index
    %c0_17 = arith.constant 0 : index
    %26 = vector.load %arg2[%c0_16, %c0_17] : memref<2x1xi32, #tpu.memory_space<vmem>>, vector<2x1xi32>
    %27 = vector.broadcast %26 : vector<2x1xi32> to vector<2x128xi32>
    %28 = arith.cmpi sge, %25, %27 : vector<2x128xi32>
    %cst_18 = arith.constant 0xFF800000 : f32
    %29 = vector.broadcast %cst_18 : f32 to vector<2x128xf32>
    %30 = arith.select %28, %29, %21 : vector<2x128xi1>, vector<2x128xf32>
    %c0_19 = arith.constant 0 : index
    %c0_20 = arith.constant 0 : index
    %31 = vector.load %arg11[%c0_19, %c0_20] : memref<2x128xf32, #tpu.memory_space<vmem>>, vector<2x128xf32>
    tpu.vector_store %arg11[%c0_19, %c0_20], %30 {strides = array<i32>} : memref<2x128xf32, #tpu.memory_space<vmem>>, vector<2x128xf32>,
    %c0_21 = arith.constant 0 : index
    %c0_22 = arith.constant 0 : index
    %32 = vector.load %arg12[%c0_21, %c0_22] : memref<2x1xf32, #tpu.memory_space<vmem>>, vector<2x1xf32>
    %cst_23 = arith.constant dense<0xFF800000> : vector<2xf32>
    %33 = vector.multi_reduction <maximumf>, %30, %cst_23 [1] : vector<2x128xf32> to vector<2xf32>
    %34 = vector.shape_cast %33 : vector<2xf32> to vector<2x1xf32>
    %35 = arith.maximumf %32, %34 : vector<2x1xf32>
    %36 = arith.subf %32, %35 : vector<2x1xf32>
    %37 = math.exp %36 : vector<2x1xf32>
    %38 = vector.broadcast %35 : vector<2x1xf32> to vector<2x128xf32>
    %39 = arith.subf %30, %38 : vector<2x128xf32>
    %40 = math.exp %39 : vector<2x128xf32>
    %c0_24 = arith.constant 0 : index
    %c0_25 = arith.constant 0 : index
    %41 = vector.load %arg13[%c0_24, %c0_25] : memref<2x1xf32, #tpu.memory_space<vmem>>, vector<2x1xf32>
    %42 = arith.mulf %37, %41 : vector<2x1xf32>
    %cst_26 = arith.constant dense<0.000000e+00> : vector<2xf32>
    %43 = vector.multi_reduction <add>, %40, %cst_26 [1] : vector<2x128xf32> to vector<2xf32>
    %44 = vector.shape_cast %43 : vector<2xf32> to vector<2x1xf32>
    %45 = arith.addf %42, %44 : vector<2x1xf32>
    %c0_27 = arith.constant 0 : index
    %c0_28 = arith.constant 0 : index
    %46 = vector.load %arg13[%c0_27, %c0_28] : memref<2x1xf32, #tpu.memory_space<vmem>>, vector<2x1xf32>
    tpu.vector_store %arg13[%c0_27, %c0_28], %45 {strides = array<i32>} : memref<2x1xf32, #tpu.memory_space<vmem>>, vector<2x1xf32>,
    %c0_29 = arith.constant 0 : index
    %c0_30 = arith.constant 0 : index
    %47 = vector.load %arg10[%c0_29, %c0_30] : memref<2x32xf32, #tpu.memory_space<vmem>>, vector<2x32xf32>
    %48 = vector.broadcast %37 : vector<2x1xf32> to vector<2x32xf32>
    %49 = arith.mulf %48, %47 : vector<2x32xf32>
    %50 = vector.shape_cast %40 : vector<2x128xf32> to vector<2x128x1xf32>
    %c0_31 = arith.constant 0 : index
    %c0_32 = arith.constant 0 : index
    %c0_33 = arith.constant 0 : index
    %51 = vector.load %arg4[%c0_31, %c0_32, %c0_33] : memref<2x128x32xf32, #tpu.memory_space<vmem>>, vector<2x128x32xf32>
    %52 = vector.broadcast %50 : vector<2x128x1xf32> to vector<2x128x32xf32>
    %53 = arith.mulf %52, %51 : vector<2x128x32xf32>
    %cst_34 = arith.constant dense<0.000000e+00> : vector<2x32xf32>
    %54 = vector.multi_reduction <add>, %53, %cst_34 [1] : vector<2x128x32xf32> to vector<2x32xf32>
    %55 = arith.addf %49, %54 : vector<2x32xf32>
    %c0_35 = arith.constant 0 : index
    %c0_36 = arith.constant 0 : index
    %56 = vector.load %arg10[%c0_35, %c0_36] : memref<2x32xf32, #tpu.memory_space<vmem>>, vector<2x32xf32>
    tpu.vector_store %arg10[%c0_35, %c0_36], %55 {strides = array<i32>} : memref<2x32xf32, #tpu.memory_space<vmem>>, vector<2x32xf32>,
    %c0_37 = arith.constant 0 : index
    %c0_38 = arith.constant 0 : index
    %57 = vector.load %arg12[%c0_37, %c0_38] : memref<2x1xf32, #tpu.memory_space<vmem>>, vector<2x1xf32>
    tpu.vector_store %arg12[%c0_37, %c0_38], %35 {strides = array<i32>} : memref<2x1xf32, #tpu.memory_space<vmem>>, vector<2x1xf32>,
    %c0_i32_39 = arith.constant 0 : i32
    %58 = arith.cmpi eq, %arg1, %c0_i32_39 : i32
    %59 = arith.extui %58 : i1 to i32
    %c0_i32_40 = arith.constant 0 : i32
    %60 = arith.cmpi ne, %59, %c0_i32_40 : i32
    scf.if %60 {
      %c0_41 = arith.constant 0 : index
      %c0_42 = arith.constant 0 : index
      %61 = vector.load %arg10[%c0_41, %c0_42] : memref<2x32xf32, #tpu.memory_space<vmem>>, vector<2x32xf32>
      %c0_43 = arith.constant 0 : index
      %c0_44 = arith.constant 0 : index
      %62 = vector.load %arg13[%c0_43, %c0_44] : memref<2x1xf32, #tpu.memory_space<vmem>>, vector<2x1xf32>
      %63 = vector.broadcast %62 : vector<2x1xf32> to vector<2x32xf32>
      %64 = arith.divf %61, %63 : vector<2x32xf32>
      %c0_45 = arith.constant 0 : index
      %c0_46 = arith.constant 0 : index
      %65 = vector.load %arg10[%c0_45, %c0_46] : memref<2x32xf32, #tpu.memory_space<vmem>>, vector<2x32xf32>
      tpu.vector_store %arg10[%c0_45, %c0_46], %64 {strides = array<i32>} : memref<2x32xf32, #tpu.memory_space<vmem>>, vector<2x32xf32>,
    } else {
    }
    return
  }
  func.func @transform_0(%arg0: i32, %arg1: i32) -> (i32, i32) {
    %c0_i32 = arith.constant 0 : i32
    %c0_i32_0 = arith.constant 0 : i32
    return %arg0, %c0_i32 : i32, i32
  }
  func.func @transform_1(%arg0: i32, %arg1: i32) -> (i32, i32) {
    %c0_i32 = arith.constant 0 : i32
    %c0_i32_0 = arith.constant 0 : i32
    return %arg0, %c0_i32 : i32, i32
  }
  func.func @transform_2(%arg0: i32, %arg1: i32) -> (i32, i32, i32) {
    %c0_i32 = arith.constant 0 : i32
    %c0_i32_0 = arith.constant 0 : i32
    return %arg0, %arg1, %c0_i32 : i32, i32, i32
  }
  func.func @transform_3(%arg0: i32, %arg1: i32) -> (i32, i32, i32) {
    %c0_i32 = arith.constant 0 : i32
    %c0_i32_0 = arith.constant 0 : i32
    return %arg0, %arg1, %c0_i32 : i32, i32, i32
  }
  func.func @transform_4(%arg0: i32, %arg1: i32) -> (i32, i32, i32) {
    %c0_i32 = arith.constant 0 : i32
    %c0_i32_0 = arith.constant 0 : i32
    return %arg0, %arg1, %c0_i32 : i32, i32, i32
  }
  func.func @transform_5(%arg0: i32, %arg1: i32) -> (i32, i32) {
    %c0_i32 = arith.constant 0 : i32
    %c0_i32_0 = arith.constant 0 : i32
    %c0_i32_1 = arith.constant 0 : i32
    return %c0_i32, %c0_i32_0 : i32, i32
  }
  func.func @transform_6(%arg0: i32, %arg1: i32) -> (i32, i32) {
    %c0_i32 = arith.constant 0 : i32
    %c0_i32_0 = arith.constant 0 : i32
    %c0_i32_1 = arith.constant 0 : i32
    return %c0_i32, %c0_i32_0 : i32, i32
  }
  func.func @transform_7(%arg0: i32, %arg1: i32) -> (i32, i32) {
    %c0_i32 = arith.constant 0 : i32
    %c0_i32_0 = arith.constant 0 : i32
    %c0_i32_1 = arith.constant 0 : i32
    return %c0_i32, %c0_i32_0 : i32, i32
  }
  func.func @transform_8(%arg0: i32, %arg1: i32) -> (i32, i32) {
    %c0_i32 = arith.constant 0 : i32
    %c0_i32_0 = arith.constant 0 : i32
    return %arg0, %c0_i32 : i32, i32
  }
  func.func @transform_9(%arg0: i32, %arg1: i32) -> (i32, i32) {
    %c0_i32 = arith.constant 0 : i32
    return %arg0, %arg1 : i32, i32
  }
  func.func @transform_10(%arg0: i32, %arg1: i32) -> (i32, i32) {
    %c0_i32 = arith.constant 0 : i32
    %c0_i32_0 = arith.constant 0 : i32
    return %arg0, %c0_i32 : i32, i32
  }
  func.func @transform_11(%arg0: i32, %arg1: i32) -> (i32, i32) {
    %c0_i32 = arith.constant 0 : i32
    %c0_i32_0 = arith.constant 0 : i32
    return %arg0, %c0_i32 : i32, i32
  }
}

</mosaic_0001>

<bundles_post_ra>
// kernel: tpu_custom_call.1
= control target key start
LH: loop header
LB: loop body
LE: loop exit
PB: predicated region body
PF: predicated region fallthrough
CT: control target
= control target key end

     0   :  { %17 = vsyncpa [#allocation3], 0  ;;  %vm254_vm0 = vcmask 1041408   ;;  %v1638_v3 = vmov 0.0   ;;  %vm157_vm1 = vcmask 80896   ;;  %vm49_vm2 = vcmask 261120   ;;  %s2386_s0 = inlined_call_operand.vmem [shape: s32[2,1], index: 0, kind: input, shape index: {}]   ;;  %s2387_s1 = inlined_call_operand.vmem [shape: f32[2,32], index: 1, kind: input, shape index: {}]   ;;  %s2388_s2 = inlined_call_operand.vmem [shape: f32[2,128,32], index: 2, kind: input, shape index: {}]   ;;  %s2389_s3 = inlined_call_operand.vmem [shape: f32[2,128,32], index: 3, kind: input, shape index: {}]   ;;  %s2390_s4 = inlined_call_operand.vmem [shape: f32[2,128,10], index: 4, kind: input, shape index: {}]   ;;  %s2391_s5 = inlined_call_operand.vmem [shape: f32[32,32], index: 5, kind: input, shape index: {}]   ;;  %s2392_s6 = inlined_call_operand.vmem [shape: f32[10,32], index: 6, kind: input, shape index: {}]   ;;  %s2393_s7 = inlined_call_operand.vmem [shape: f32[1,32], index: 7, kind: input, shape index: {}]   ;;  %s2394_s8 = inlined_call_operand.hbm [shape: f32[2,32], index: 8, kind: output, shape index: {0}]   ;;  %s2395_s9 = inlined_call_operand.hbm [shape: f32[2,128], index: 9, kind: output, shape index: {1}]   ;;  %s2396_s10 = inlined_call_operand.vmem [shape: f32[2,1], index: 10, kind: output, shape index: {2}]   ;;  %s2397_s11 = inlined_call_operand.vmem [shape: f32[2,1], index: 11, kind: output, shape index: {3}]  }
   0x1   :  { %v156_v0 = vld [vmem:[%s2392_s6 + $0x8] sm:$0x3]  ;;  %v48_v1 = vld [vmem:[%s2391_s5 + $0x18] sm:$0xff]  ;;  %v155_v2 = vld [vmem:[%s2392_s6] sm:$0xff]  ;;  %1448 = vmatprep.subr.mxu0 %v1638_v3  ;;  %vm1639_vm3 = vmmov 0  }
   0x2   :  { %1511 = vmatprep.subr.msk.mxu1 %vm254_vm0, %v156_v0  ;;  %v47_v4 = vld [vmem:[%s2391_s5 + $0x10] sm:$0xff]  ;;  %1449 = vmatpush3.msra.mxu0 %v48_v1  ;;  %v138_v6 = vld [vmem:[%s2390_s4 + $0x78] sm:$0xff]  ;;  %v46_v7 = vld [vmem:[%s2391_s5 + $0x8] sm:$0xff] }
   0x3   :  { %1513 = vmatpush3.msk.msra.mxu1 %vm254_vm0, %v156_v0  ;;  %v137_v5 = vld [vmem:[%s2390_s4 + $0x70] sm:$0xff]  ;;  %1450 = vmatprep.subr.mxu0 %v1638_v3  ;;  %v45_v8 = vld [vmem:[%s2391_s5] sm:$0xff]  ;;  %v140_v11 = vld [vmem:[%s2390_s4 + $0x88] sm:$0xff] }
   0x4   :  { %1512 = vmatprep.subr.mxu1 %v155_v2  ;;  %1451 = vmatpush3.msra.mxu0 %v47_v4  ;;  %v139_v9 = vld [vmem:[%s2390_s4 + $0x80] sm:$0xff]  ;;  %v141_v13 = vld [vmem:[%s2390_s4 + $0x90] sm:$0xff]  ;;  %v124_v14 = vld [vmem:[%s2390_s4 + $0x8] sm:$0xff] }
   0x5   :  { %1514 = vmatpush3.msra.mxu1 %v155_v2  ;;  %1484 = vmatprep.mubr.msk.f32.mxu1 %vm157_vm1, %v137_v5  ;;  %v44_v10 = vld [vmem:[%s2387_s1] sm:$0x3]  ;;  %v142_v15 = vld [vmem:[%s2390_s4 + $0x98] sm:$0xff]  ;;  %v125_v16 = vld [vmem:[%s2390_s4 + $0x10] sm:$0xff] }
   0x6   :  { %1452 = vmatprep.subr.mxu0 %v1638_v3  ;;  %1485 = vmatmul.mubr.msk.f32.vlgmr.msra.gmra.mxu1 %vm157_vm1, %v138_v6  ;;  %v123_v12 = vld [vmem:[%s2390_s4] sm:$0xff] }
   0x7   :  { %1453 = vmatpush3.msra.mxu0 %v46_v7  ;;  %1456 = vmatprep.mubr.msk.f32.mxu0 %vm1639_vm3, %v1638_v3  ;;  %v143_v17 = vld [vmem:[%s2390_s4 + $0xa0] sm:$0xff] }
   0x8   :  { %1454 = vmatprep.subr.mxu0 %v1638_v3  ;;  %1487 = vmatprep.mubr.msk.f32.mxu1 %vm157_vm1, %v139_v9 }
   0x9   :  { %1455 = vmatpush3.msra.mxu0 %v45_v8 }
   0xa   :  { %1457 = vmatmul.mubr.msk.f32.vlgmr.msra.gmra.mxu0 %vm49_vm2, %v44_v10  ;;  %1459 = vmatprep.subr.msk.mxu0 %vm254_vm0, %v156_v0 }
   0xb   :  { %1488 = vmatmul.mubr.msk.f32.gmra.mxu1 %vm157_vm1, %v140_v11  ;;  %1460 = vmatpush3.msk.msra.mxu0 %vm254_vm0, %v156_v0 }
   0xc   :  { %1461 = vmatprep.subr.mxu0 %v155_v2  ;;  %1463 = vmatprep.mubr.msk.f32.mxu0 %vm157_vm1, %v123_v12 }
   0xd   :  { %1462 = vmatpush3.msra.mxu0 %v155_v2  ;;  %1490 = vmatprep.mubr.msk.f32.mxu1 %vm157_vm1, %v141_v13 }
   0xe   :  { %1464 = vmatmul.mubr.msk.f32.vlgmr.msra.gmra.mxu0 %vm157_vm1, %v124_v14 }
   0xf   :  { %18 = vsyncpa [#allocation5], 0  ;;  %1491 = vmatmul.mubr.msk.f32.gmra.mxu1 %vm157_vm1, %v142_v15  ;;  %1466 = vmatprep.mubr.msk.f32.mxu0 %vm157_vm1, %v125_v16  ;;  %v126_v18 = vld [vmem:[%s2390_s4 + $0x18] sm:$0xff]  ;;  %v144_v19 = vld [vmem:[%s2390_s4 + $0xa8] sm:$0xff]  ;;  %v1640_v40 = vmov 0   ;;  %v487_v43 = vlaneseq  ;;  %vm830_vm4 = vcmask 130112  }
  0x10   :  { %1493 = vmatprep.mubr.msk.f32.mxu1 %vm157_vm1, %v143_v17  ;;  %v127_v20 = vld [vmem:[%s2390_s4 + $0x20] sm:$0xff]  ;;  %v145_v21 = vld [vmem:[%s2390_s4 + $0xb0] sm:$0xff]  ;;  %v128_v22 = vld [vmem:[%s2390_s4 + $0x28] sm:$0xff]  ;;  %1522 = vset.pattern.permute.xlu0 %v1640_v40  ;;  %v1641_v41 = vmov 1966171168   ;;  %vm837_vm5 = vcmask 195712  }
  0x11   :  { %v146_v23 = vld [vmem:[%s2390_s4 + $0xb8] sm:$0xff]  ;;  %v129_v24 = vld [vmem:[%s2390_s4 + $0x30] sm:$0xff]  ;;  %v147_v25 = vld [vmem:[%s2390_s4 + $0xc0] sm:$0xff]  ;;  %1523 = vset.pattern.permute.xlu1 %v1640_v40  ;;  %v485_v42 = vunpack.c.l.s4 %v1641_v41  ;;  %v1865_v45 = vshrl.u32 %v487_v43, 7  ;;  %vm844_vm6 = vcmask 261312   ;;  %vm851_vm7 = vcmask 326912  }
  0x12   :  { %1467 = vmatmul.mubr.msk.f32.gmra.mxu0 %vm157_vm1, %v126_v18  ;;  %v130_v26 = vld [vmem:[%s2390_s4 + $0x38] sm:$0xff]  ;;  %v148_v27 = vld [vmem:[%s2390_s4 + $0xc8] sm:$0xff]  ;;  %v131_v28 = vld [vmem:[%s2390_s4 + $0x40] sm:$0xff]  ;;  %vm858_vm8 = vcmask 392512   ;;  %vm865_vm9 = vcmask 458112   ;;  %vm872_vm10 = vcmask 523712  }
  0x13   :  { %1494 = vmatmul.mubr.msk.f32.gmra.mxu1 %vm157_vm1, %v144_v19  ;;  %1469 = vmatprep.mubr.msk.f32.mxu0 %vm157_vm1, %v127_v20  ;;  %v149_v29 = vld [vmem:[%s2390_s4 + $0xd0] sm:$0xff]  ;;  %v132_v30 = vld [vmem:[%s2390_s4 + $0x48] sm:$0xff]  ;;  %v150_v31 = vld [vmem:[%s2390_s4 + $0xd8] sm:$0xff]  ;;  %v486_v44 = vunpack.c.0.s8 %v485_v42  ;;  %v1873_v51 = vsub.s32 0, %v1865_v45  ;;  %vm879_vm11 = vcmask 589312   ;;  %vm886_vm12 = vcmask 654912  }
  0x14   :  { %1496 = vmatprep.mubr.msk.f32.mxu1 %vm157_vm1, %v145_v21  ;;  %v133_v32 = vld [vmem:[%s2390_s4 + $0x50] sm:$0xff]  ;;  %v151_v33 = vld [vmem:[%s2390_s4 + $0xe0] sm:$0xff]  ;;  %v134_v34 = vld [vmem:[%s2390_s4 + $0x58] sm:$0xff]  ;;  %vm893_vm13 = vcmask 720512   ;;  %vm900_vm14 = vcmask 786112   ;;  %vm907_vm15 = vcmask 851712  }
  0x15   :  { %v152_v35 = vld [vmem:[%s2390_s4 + $0xe8] sm:$0xff]  ;;  %v135_v36 = vld [vmem:[%s2390_s4 + $0x60] sm:$0xff]  ;;  %v153_v37 = vld [vmem:[%s2390_s4 + $0xf0] sm:$0xff]  ;;  %v489_v47 = vsub.s32 %v486_v44, %v1865_v45  ;;  %vm921_vm3 = vcmask 982912  }
  0x16   :  { %1470 = vmatmul.mubr.msk.f32.gmra.mxu0 %vm157_vm1, %v128_v22  ;;  %v136_v38 = vld [vmem:[%s2390_s4 + $0x68] sm:$0xff]  ;;  %v154_v39 = vld [vmem:[%s2390_s4 + $0xf8] sm:$0xff]  ;;  %v548_v2 = vld [vmem:[%s2389_s3] sm:$0xff] }
  0x17   :  { %1497 = vmatmul.mubr.msk.f32.gmra.mxu1 %vm157_vm1, %v146_v23  ;;  %1472 = vmatprep.mubr.msk.f32.mxu0 %vm157_vm1, %v129_v24  ;;  %v549_v61 = vld [vmem:[%s2389_s3 + $0x8] sm:$0xff]  ;;  %v564_v5 = vld [vmem:[%s2389_s3 + $0x80] sm:$0xff]  ;;  %v566_v16 = vld [vmem:[%s2389_s3 + $0x90] sm:$0xff] }
  0x18   :  { %1499 = vmatprep.mubr.msk.f32.mxu1 %vm157_vm1, %v147_v25  ;;  %v565_v4 = vld [vmem:[%s2389_s3 + $0x88] sm:$0xff]  ;;  %v567_v22 = vld [vmem:[%s2389_s3 + $0x98] sm:$0xff] }
  0x1a   :  { %1473 = vmatmul.mubr.msk.f32.gmra.mxu0 %vm157_vm1, %v130_v26 }
  0x1b   :  { %1500 = vmatmul.mubr.msk.f32.gmra.mxu1 %vm157_vm1, %v148_v27  ;;  %1475 = vmatprep.mubr.msk.f32.mxu0 %vm157_vm1, %v131_v28  ;;  %v569_v28 = vld [vmem:[%s2389_s3 + $0xa8] sm:$0xff] }
  0x1c   :  { %1502 = vmatprep.mubr.msk.f32.mxu1 %vm157_vm1, %v149_v29 }
  0x1e   :  { %1476 = vmatmul.mubr.msk.f32.gmra.mxu0 %vm157_vm1, %v132_v30 }
  0x1f   :  { %1503 = vmatmul.mubr.msk.f32.gmra.mxu1 %vm157_vm1, %v150_v31  ;;  %1478 = vmatprep.mubr.msk.f32.mxu0 %vm157_vm1, %v133_v32 }
  0x20   :  { %1505 = vmatprep.mubr.msk.f32.mxu1 %vm157_vm1, %v151_v33 }
  0x22   :  { %1479 = vmatmul.mubr.msk.f32.gmra.mxu0 %vm157_vm1, %v134_v34  ;;  %v568_v34 = vld [vmem:[%s2389_s3 + $0xa0] sm:$0xff] }
  0x23   :  { %1506 = vmatmul.mubr.msk.f32.gmra.mxu1 %vm157_vm1, %v152_v35  ;;  %1481 = vmatprep.mubr.msk.f32.mxu0 %vm157_vm1, %v135_v36  ;;  %v1931_v36 = vld [vmem:[%s2393_s7] ss:$0 sm:$0xff] }
  0x24   :  { %1508 = vmatprep.mubr.msk.f32.mxu1 %vm157_vm1, %v153_v37 }
  0x26   :  { %1482 = vmatmul.mubr.msk.f32.gmra.mxu0 %vm157_vm1, %v136_v38 }
  0x27   :  { %1509 = vmatmul.mubr.msk.f32.gmra.mxu1 %vm157_vm1, %v154_v39  ;;  %v556_v39 = vld [vmem:[%s2389_s3 + $0x40] sm:$0xff]  ;;  %vm914_vm1 = vcmask 917312  }
  0xc6   :  { %v1867_v46 = vpop.f32.mrf.mxu1 }
  0xc8   :  { %v1870_v48 = vpop.f32.mrf.mxu1 }
  0xca   :  { %v119_v49 = vpop.f32.mrf.mxu0 }
  0xcb   :  { %v490_v50 = vrot.slane %v119_v49, %v489_v47  ;;  %v1489_v52 = vpop.f32.mrf.mxu1  ;;  %v559_v49 = vld [vmem:[%s2389_s3 + $0x58] sm:$0xff] }
  0xcc   :  { %v1458_v53 = vpop.f32.mrf.mxu0 }
  0xcd   :  { %v491_v54 = vcombine.high %v490_v50, %v490_v50  ;;  %v498_v55 = vrot.slane %v490_v50, %v489_v47  ;;  %v404_v56 = vpop.f32.mrf.mxu1 }
  0xce   :  { %v1465_v57 = vpop.f32.mrf.mxu0 }
  0xcf   :  { %v505_v58 = vrot.slane %v491_v54, %v489_v47  ;;  %v1876_v59 = vrot.slane %v498_v55, %v1873_v51  ;;  %v1492_v60 = vpop.f32.mrf.mxu1  ;;  %v571_v54 = vld [vmem:[%s2389_s3 + $0xb8] sm:$0xff] }
  0xd0   :  { %v324_v62 = vpop.f32.mrf.mxu0 }
  0xd1   :  { %v1882_v63 = vrot.slane %v505_v58, %v1873_v51  ;;  %v517_v0 = vadd.f32 %v1465_v57, %v1876_v59  ;;  %v516_v1 = vadd.f32 %v1876_v59, %v324_v62  ;;  %v414_v6 = vpop.f32.mrf.mxu1 }
  0xd2   :  { %v1895_v7 = vpop.f32.mrf.mxu0 }
  0xd3   :  { %v533_v8 = vadd.f32 %v1489_v52, %v1882_v63  ;;  %v532_v9 = vadd.f32 %v1882_v63, %v404_v56  ;;  %v581_v10 = vadd.f32 %v549_v61, %v517_v0  ;;  %v580_v11 = vadd.f32 %v548_v2, %v516_v1  ;;  %v1495_v17 = vpop.f32.mrf.mxu1 }
  0xd4   :  { %v1899_v12 = vpop.f32.mrf.mxu0  ;;  %v534_v15 = vadd.f32 %v1882_v63, %v414_v6  ;;  %v535_v20 = vadd.f32 %v1492_v60, %v1882_v63  ;;  %v537_v27 = vadd.f32 %v1495_v17, %v1882_v63  ;;  %v558_v60 = vld [vmem:[%s2389_s3 + $0x50] sm:$0xff] }
  0xd5   :  { %v597_v13 = vadd.f32 %v565_v4, %v533_v8  ;;  %v596_v14 = vadd.f32 %v564_v5, %v532_v9  ;;  %1524 = vtanh.f32 %v581_v10  ;;  %v424_v23 = vpop.f32.mrf.mxu1  ;;  %v561_v10 = vld [vmem:[%s2389_s3 + $0x68] sm:$0xff] }
  0xd6   :  { %1526 = vtanh.f32 %v580_v11  ;;  %v1905_v18 = vpop.f32.mrf.mxu0  ;;  %v598_v21 = vadd.f32 %v566_v16, %v534_v15  ;;  %v599_v26 = vadd.f32 %v567_v22, %v535_v20  ;;  %v536_v31 = vadd.f32 %v1882_v63, %v424_v23  ;;  %v570_v15 = vld [vmem:[%s2389_s3 + $0xb0] sm:$0xff] }
  0xd7   :  { %1528 = vtanh.f32 %v596_v14  ;;  %v1498_v29 = vpop.f32.mrf.mxu1  ;;  %v601_v33 = vadd.f32 %v569_v28, %v537_v27  ;;  %v530_v22 = vadd.f32 %v1876_v59, %v1870_v48  ;;  %v562_v27 = vld [vmem:[%s2389_s3 + $0x70] sm:$0xff]  ;;  %v531_v28 = vadd.f32 %v1867_v46, %v1876_v59 }
  0xd8   :  { %v1907_v19 = vpop.f32.mrf.mxu0  ;;  %1530 = vtanh.f32 %v597_v13  ;;  %v600_v44 = vadd.f32 %v568_v34, %v536_v31  ;;  %v539_v47 = vadd.f32 %v1498_v29, %v1882_v63  ;;  %v573_v31 = vld [vmem:[%s2389_s3 + $0xc8] sm:$0xff]  ;;  %v519_v46 = vadd.f32 %v1895_v7, %v1876_v59  ;;  %v572_v7 = vld [vmem:[%s2389_s3 + $0xc0] sm:$0xff] }
  0xd9   :  { %1532 = vtanh.f32 %v598_v21  ;;  %v434_v38 = vpop.f32.mrf.mxu1  ;;  %v560_v21 = vld [vmem:[%s2389_s3 + $0x60] sm:$0xff] }
  0xda   :  { %v1913_v24 = vpop.f32.mrf.mxu0  ;;  %1534 = vtanh.f32 %v599_v26  ;;  %v603_v4 = vadd.f32 %v571_v54, %v539_v47  ;;  %v538_v5 = vadd.f32 %v1882_v63, %v434_v38  ;;  %v594_v38 = vadd.f32 %v562_v27, %v530_v22  ;;  %v550_v54 = vld [vmem:[%s2389_s3 + $0x10] sm:$0xff]  ;;  %v577_v27 = vld [vmem:[%s2389_s3 + $0xe8] sm:$0xff] }
  0xdb   :  { %1536 = vtanh.f32 %v601_v33  ;;  %v1501_v58 = vpop.f32.mrf.mxu1  ;;  %v563_v33 = vld [vmem:[%s2389_s3 + $0x78] sm:$0xff] }
  0xdc   :  { %v1915_v25 = vpop.f32.mrf.mxu0  ;;  %1538 = vtanh.f32 %v600_v44  ;;  %v541_v23 = vadd.f32 %v1501_v58, %v1882_v63  ;;  %v602_v29 = vadd.f32 %v570_v15, %v538_v5  ;;  %v575_v58 = vld [vmem:[%s2389_s3 + $0xd8] sm:$0xff]  ;;  %v553_v5 = vld [vmem:[%s2389_s3 + $0x28] sm:$0xff] }
  0xdd   :  { %v444_v16 = vpop.f32.mrf.mxu1 }
  0xde   :  { %v1921_v30 = vpop.f32.mrf.mxu0 }
  0xe0   :  { %v364_v32 = vpop.f32.mrf.mxu0 }
  0xe1   :  { %v524_v35 = vadd.f32 %v1876_v59, %v364_v32 }
  0xe2   :  { %v1525_v37 = vpop.eup %1524  ;;  %v1480_v40 = vpop.f32.mrf.mxu0 }
  0xe3   :  { %v1527_v41 = vpop.eup %1526  ;;  %v527_v42 = vadd.f32 %v1480_v40, %v1876_v59  ;;  %v588_v55 = vadd.f32 %v556_v39, %v524_v35  ;;  %v652_v0 = vmul.f32 %v1525_v37, %v1931_v36  ;;  %v1504_v35 = vpop.f32.mrf.mxu1  ;;  %v551_v39 = vld [vmem:[%s2389_s3 + $0x18] sm:$0xff]  ;;  %v605_v40 = vadd.f32 %v573_v31, %v541_v23 }
  0xe4   :  { %v374_v50 = vpop.f32.mrf.mxu0  ;;  %v651_v52 = vmul.f32 %v1527_v41, %v1931_v36  ;;  %v1529_v53 = vpop.eup %1528  ;;  %v595_v41 = vadd.f32 %v563_v33, %v531_v28 }
  0xe5   :  { %v526_v56 = vadd.f32 %v1876_v59, %v374_v50  ;;  %v1531_v57 = vpop.eup %1530  ;;  %v591_v1 = vadd.f32 %v559_v49, %v527_v42  ;;  %v667_v2 = vmul.f32 %v1529_v53, %v1931_v36  ;;  %1540 = vtanh.f32 %v588_v55  ;;  %v454_v50 = vpop.f32.mrf.mxu1 }
  0xe6   :  { %v683_v61 = vsel %vm49_vm2, %v651_v52, 0.0  ;;  %v1483_v62 = vpop.f32.mrf.mxu0  ;;  %v668_v13 = vmul.f32 %v1531_v57, %v1931_v36  ;;  %v1533_v14 = vpop.eup %1532  ;;  %v686_v20 = vsel %vm49_vm2, %v652_v0, 0.0  ;;  %v540_v42 = vadd.f32 %v1882_v63, %v444_v16 }
  0xe7   :  { %684 = vadd.xlane.f32.xlu0 %v683_v61  ;;  %v529_v6 = vadd.f32 %v1483_v62, %v1876_v59  ;;  %v590_v9 = vadd.f32 %v558_v60, %v526_v56  ;;  %v731_v11 = vsel %vm49_vm2, %v667_v2, 0.0  ;;  %1542 = vtanh.f32 %v591_v1  ;;  %v1535_v34 = vpop.eup %1534  ;;  %v1507_v62 = vpop.f32.mrf.mxu1 }
  0xe8   :  { %v384_v8 = vpop.f32.mrf.mxu0  ;;  %732 = vadd.xlane.f32.xlu1 %v731_v11  ;;  %1544 = vtanh.f32 %v603_v4  ;;  %v734_v32 = vsel %vm49_vm2, %v668_v13, 0.0  ;;  %v669_v48 = vmul.f32 %v1533_v14, %v1931_v36  ;;  %v670_v47 = vmul.f32 %v1535_v34, %v1931_v36  ;;  %v1537_v49 = vpop.eup %1536  ;;  %v574_v14 = vld [vmem:[%s2389_s3 + $0xd0] sm:$0xff] }
  0xe9   :  { %v528_v17 = vadd.f32 %v1876_v59, %v384_v8  ;;  %v593_v26 = vadd.f32 %v561_v10, %v529_v6  ;;  %1546 = vtanh.f32 %v590_v9  ;;  %v583_v52 = vadd.f32 %v551_v39, %v519_v46  ;;  %v1539_v56 = vpop.eup %1538  ;;  %v464_v15 = vpop.f32.mrf.mxu1 }
  0xea   :  { %v737_v44 = vsel %vm49_vm2, %v669_v48, 0.0  ;;  %v518_v53 = vadd.f32 %v1876_v59, %v1899_v12  ;;  %v543_v55 = vadd.f32 %v1504_v35, %v1882_v63  ;;  %v604_v57 = vadd.f32 %v572_v7, %v540_v42 }
  0xeb   :  { %687 = vadd.xlane.f32.xlu0 %v686_v20  ;;  %v592_v37 = vadd.f32 %v560_v21, %v528_v17  ;;  %1548 = vtanh.f32 %v593_v26  ;;  %v740_v60 = vsel %vm49_vm2, %v670_v47, 0.0  ;;  %v672_v61 = vmul.f32 %v1537_v49, %v1931_v36  ;;  %v552_v21 = vld [vmem:[%s2389_s3 + $0x20] sm:$0xff]  ;;  %v1510_v31 = vpop.f32.mrf.mxu1 }
  0xec   :  { %735 = vadd.xlane.f32.xlu1 %v734_v32  ;;  %1550 = vtanh.f32 %v602_v29  ;;  %v582_v0 = vadd.f32 %v550_v54, %v518_v53  ;;  %v521_v1 = vadd.f32 %v1905_v18, %v1876_v59  ;;  %v607_v6 = vadd.f32 %v575_v58, %v543_v55 }
  0xed   :  { %1552 = vtanh.f32 %v592_v37  ;;  %v542_v8 = vadd.f32 %v1882_v63, %v454_v50  ;;  %v746_v10 = vsel %vm49_vm2, %v672_v61, 0.0  ;;  %v671_v11 = vmul.f32 %v1539_v56, %v1931_v36  ;;  %v555_v37 = vld [vmem:[%s2389_s3 + $0x38] sm:$0xff]  ;;  %v474_v7 = vpop.f32.mrf.mxu1 }
  0xee   :  { %1554 = vtanh.f32 %v594_v38  ;;  %v585_v16 = vadd.f32 %v553_v5, %v521_v1  ;;  %v520_v17 = vadd.f32 %v1876_v59, %v1907_v19  ;;  %v545_v22 = vadd.f32 %v1507_v62, %v1882_v63  ;;  %v557_v5 = vld [vmem:[%s2389_s3 + $0x48] sm:$0xff] }
  0xef   :  { %1556 = vtanh.f32 %v595_v41  ;;  %v606_v26 = vadd.f32 %v574_v14, %v542_v8  ;;  %v743_v28 = vsel %vm49_vm2, %v671_v11, 0.0  ;;  %v523_v34 = vadd.f32 %v1913_v24, %v1876_v59  ;;  %v576_v41 = vld [vmem:[%s2389_s3 + $0xe0] sm:$0xff] }
  0xf0   :  { %738 = vadd.xlane.f32.xlu1 %v737_v44  ;;  %1558 = vtanh.f32 %v605_v40  ;;  %v584_v33 = vadd.f32 %v552_v21, %v520_v17  ;;  %v609_v46 = vadd.f32 %v577_v27, %v545_v22  ;;  %v544_v38 = vadd.f32 %v1882_v63, %v464_v15 }
  0xf1   :  { %1560 = vtanh.f32 %v583_v52  ;;  %v522_v49 = vadd.f32 %v1876_v59, %v1915_v25  ;;  %v587_v50 = vadd.f32 %v555_v37, %v523_v34  ;;  %v554_v52 = vld [vmem:[%s2389_s3 + $0x30] sm:$0xff]  ;;  %v525_v62 = vadd.f32 %v1921_v30, %v1876_v59  ;;  %v579_v59 = vld [vmem:[%s2389_s3 + $0xf8] sm:$0xff] }
  0xf2   :  { %v1541_v12 = vpop.eup %1540  ;;  %1562 = vtanh.f32 %v604_v57  ;;  %v608_v56 = vadd.f32 %v576_v41, %v544_v38  ;;  %v546_v57 = vadd.f32 %v1882_v63, %v474_v7 }
  0xf3   :  { %v2008_v2 = vmul.f32 %v1541_v12, %v1931_v36  ;;  %1564 = vtanh.f32 %v582_v0  ;;  %v586_v61 = vadd.f32 %v554_v52, %v522_v49  ;;  %v578_v12 = vld [vmem:[%s2389_s3 + $0xf0] sm:$0xff]  ;;  %v589_v30 = vadd.f32 %v557_v5, %v525_v62 }
  0xf4   :  { %741 = vadd.xlane.f32.xlu1 %v740_v60  ;;  %v1543_v4 = vpop.eup %1542  ;;  %1566 = vtanh.f32 %v607_v6  ;;  %v547_v6 = vadd.f32 %v1510_v31, %v1882_v63  ;;  %v610_v8 = vadd.f32 %v578_v12, %v546_v57 }
  0xf5   :  { %v1545_v9 = vpop.eup %1544  ;;  %v2017_v13 = vmul.f32 %v1543_v4, %v1931_v36  ;;  %1568 = vtanh.f32 %v585_v16 }
  0xf6   :  { %v1547_v18 = vpop.eup %1546  ;;  %v674_v19 = vmul.f32 %v1545_v9, %v1931_v36  ;;  %1570 = vtanh.f32 %v606_v26  ;;  %v611_v15 = vadd.f32 %v579_v59, %v547_v6 }
  0xf7   :  { %v2025_v20 = vmul.f32 %v1547_v18, %v1931_v36  ;;  %1572 = vtanh.f32 %v584_v33 }
  0xf8   :  { %747 = vadd.xlane.f32.xlu1 %v746_v10  ;;  %v1549_v23 = vpop.eup %1548  ;;  %v752_v24 = vsel %vm49_vm2, %v674_v19, 0.0  ;;  %1574 = vtanh.f32 %v609_v46 }
  0xf9   :  { %v1551_v29 = vpop.eup %1550  ;;  %v2037_v32 = vmul.f32 %v1549_v23, %v1931_v36  ;;  %1576 = vtanh.f32 %v587_v50 }
  0xfa   :  { %v1553_v48 = vpop.eup %1552  ;;  %v673_v44 = vmul.f32 %v1551_v29, %v1931_v36  ;;  %1578 = vtanh.f32 %v608_v56 }
  0xfb   :  { %v1555_v35 = vpop.eup %1554  ;;  %v2046_v39 = vmul.f32 %v1553_v48, %v1931_v36  ;;  %1580 = vtanh.f32 %v586_v61 }
  0xfc   :  { %744 = vadd.xlane.f32.xlu1 %v743_v28  ;;  %v1557_v40 = vpop.eup %1556  ;;  %v665_v42 = vmul.f32 %v1555_v35, %v1931_v36  ;;  %v749_v25 = vsel %vm49_vm2, %v673_v44, 0.0  ;;  %1582 = vtanh.f32 %v610_v8 }
  0xfd   :  { %v1559_v47 = vpop.eup %1558  ;;  %v666_v54 = vmul.f32 %v1557_v40, %v1931_v36  ;;  %1584 = vtanh.f32 %v589_v30  ;;  %v719_v61 = vsel %vm49_vm2, %v2046_v39, 0.0 }
  0xfe   :  { %v725_v53 = vsel %vm49_vm2, %v665_v42, 0.0  ;;  %v1561_v55 = vpop.eup %1560  ;;  %v676_v58 = vmul.f32 %v1559_v47, %v1931_v36  ;;  %1586 = vtanh.f32 %v611_v15 }
  0xff   :  { %726 = vadd.xlane.f32.xlu0 %v725_v53  ;;  %v1563_v60 = vpop.eup %1562  ;;  %v728_v0 = vsel %vm49_vm2, %v666_v54, 0.0  ;;  %v654_v1 = vmul.f32 %v1561_v55, %v1931_v36 }
 0x100   :  { %753 = vadd.xlane.f32.xlu1 %v752_v24  ;;  %v1565_v4 = vpop.eup %1564  ;;  %v758_v9 = vsel %vm49_vm2, %v676_v58, 0.0  ;;  %v675_v10 = vmul.f32 %v1563_v60, %v1931_v36  ;;  %v716_v58 = vsel %vm49_vm2, %v2017_v13, 0.0  ;;  %v713_v60 = vsel %vm49_vm2, %v2025_v20, 0.0 }
 0x101   :  { %v1567_v11 = vpop.eup %1566  ;;  %v692_v18 = vsel %vm49_vm2, %v654_v1, 0.0  ;;  %v653_v14 = vmul.f32 %v1565_v4, %v1931_v36 }
 0x102   :  { %v1569_v63 = vpop.eup %1568  ;;  %v755_v16 = vsel %vm49_vm2, %v675_v10, 0.0  ;;  %v678_v17 = vmul.f32 %v1567_v11, %v1931_v36 }
 0x103   :  { %729 = vadd.xlane.f32.xlu0 %v728_v0  ;;  %v1571_v21 = vpop.eup %1570  ;;  %v689_v22 = vsel %vm49_vm2, %v653_v14, 0.0  ;;  %v656_v23 = vmul.f32 %v1569_v63, %v1931_v36 }
 0x104   :  { %750 = vadd.xlane.f32.xlu1 %v749_v25  ;;  %v1573_v26 = vpop.eup %1572  ;;  %v764_v27 = vsel %vm49_vm2, %v678_v17, 0.0  ;;  %v677_v28 = vmul.f32 %v1571_v21, %v1931_v36  ;;  %v707_v25 = vsel %vm49_vm2, %v2008_v2, 0.0  ;;  %v784_v2 = vld [vmem:[%s2386_s0] sm:$0x3] }
 0x105   :  { %v1575_v19 = vpop.eup %1574  ;;  %v698_v29 = vsel %vm49_vm2, %v656_v23, 0.0  ;;  %v655_v31 = vmul.f32 %v1573_v26, %v1931_v36 }
 0x106   :  { %v1577_v48 = vpop.eup %1576  ;;  %v761_v33 = vsel %vm49_vm2, %v677_v28, 0.0  ;;  %v680_v34 = vmul.f32 %v1575_v19, %v1931_v36 }
 0x107   :  { %693 = vadd.xlane.f32.xlu0 %v692_v18  ;;  %v1579_v35 = vpop.eup %1578  ;;  %v695_v37 = vsel %vm49_vm2, %v655_v31, 0.0  ;;  %v658_v46 = vmul.f32 %v1577_v48, %v1931_v36  ;;  %v2136_v18 = vand.u32 127, %v487_v43 }
 0x108   :  { %759 = vadd.xlane.f32.xlu1 %v758_v9  ;;  %v1581_v38 = vpop.eup %1580  ;;  %v770_v40 = vsel %vm49_vm2, %v680_v34, 0.0  ;;  %v679_v41 = vmul.f32 %v1579_v35, %v1931_v36 }
 0x109   :  { %v1583_v42 = vpop.eup %1582  ;;  %v704_v24 = vsel %vm49_vm2, %v658_v46, 0.0  ;;  %v657_v44 = vmul.f32 %v1581_v38, %v1931_v36  ;;  %v825_v15 = vadd.s32 4294967288, %v2136_v18  ;;  %v839_v17 = vadd.s32 4294967272, %v2136_v18 }
 0x10a   :  { %v1585_v47 = vpop.eup %1584  ;;  %v767_v49 = vsel %vm49_vm2, %v679_v41, 0.0  ;;  %v681_v7 = vmul.f32 %v1583_v42, %v1931_v36  ;;  %v823_v43 = vsub.s32 %v2136_v18, %v1865_v45  ;;  %v860_v31 = vadd.s32 4294967248, %v2136_v18 }
 0x10b   :  { %690 = vadd.xlane.f32.xlu0 %v689_v22  ;;  %v1587_v50 = vpop.eup %1586  ;;  %v701_v52 = vsel %vm49_vm2, %v657_v44, 0.0  ;;  %v660_v53 = vmul.f32 %v1585_v47, %v1931_v36  ;;  %v846_v22 = vadd.s32 4294967264, %v2136_v18  ;;  %v828_v23 = vsub.s32 %v825_v15, %v1865_v45 }
 0x10c   :  { %756 = vadd.xlane.f32.xlu1 %v755_v16  ;;  %v773_v54 = vsel %vm49_vm2, %v681_v7, 0.0  ;;  %v682_v55 = vmul.f32 %v1587_v50, %v1931_v36  ;;  %v722_v36 = vsel %vm49_vm2, %v2037_v32, 0.0  ;;  %v832_v16 = vadd.s32 4294967280, %v2136_v18 }
 0x10d   :  { %v710_v56 = vsel %vm49_vm2, %v660_v53, 0.0  ;;  %v842_v28 = vsub.s32 %v839_v17, %v1865_v45  ;;  %v853_v34 = vadd.s32 4294967256, %v2136_v18  ;;  %v867_v41 = vadd.s32 4294967240, %v2136_v18 }
 0x10e   :  { %v776_v57 = vsel %vm49_vm2, %v682_v55, 0.0  ;;  %v835_v26 = vsub.s32 %v832_v16, %v1865_v45  ;;  %v863_v44 = vsub.s32 %v860_v31, %v1865_v45  ;;  %v874_v47 = vadd.s32 4294967232, %v2136_v18 }
 0x10f   :  { %699 = vadd.xlane.f32.xlu0 %v698_v29  ;;  %v849_v29 = vsub.s32 %v846_v22, %v1865_v45  ;;  %v902_v16 = vadd.s32 4294967200, %v2136_v18 }
 0x110   :  { %765 = vadd.xlane.f32.xlu1 %v764_v27 }
 0x111   :  { %v905_v31 = vsub.s32 %v902_v16, %v1865_v45 }
 0x113   :  { %696 = vadd.xlane.f32.xlu0 %v695_v37 }
 0x114   :  { %762 = vadd.xlane.f32.xlu1 %v761_v33 }
 0x117   :  { %705 = vadd.xlane.f32.xlu0 %v704_v24 }
 0x118   :  { %771 = vadd.xlane.f32.xlu1 %v770_v40 }
 0x11b   :  { %702 = vadd.xlane.f32.xlu0 %v701_v52  ;;  %v856_v52 = vsub.s32 %v853_v34, %v1865_v45 }
 0x11c   :  { %768 = vadd.xlane.f32.xlu1 %v767_v49 }
 0x11f   :  { %711 = vadd.xlane.f32.xlu0 %v710_v56 }
 0x120   :  { %774 = vadd.xlane.f32.xlu1 %v773_v54 }
 0x123   :  { %708 = vadd.xlane.f32.xlu0 %v707_v25  ;;  %v870_v25 = vsub.s32 %v867_v41, %v1865_v45 }
 0x124   :  { %777 = vadd.xlane.f32.xlu1 %v776_v57 }
 0x127   :  { %717 = vadd.xlane.f32.xlu0 %v716_v58 }
 0x12b   :  { %714 = vadd.xlane.f32.xlu0 %v713_v60 }
 0x12f   :  { %723 = vadd.xlane.f32.xlu0 %v722_v36 }
 0x133   :  { %720 = vadd.xlane.f32.xlu0 %v719_v61  ;;  %v877_v61 = vsub.s32 %v874_v47, %v1865_v45 }
 0x149   :  { %786 = vperm.xlu0 %1522, %v784_v2   ;;  %v888_v2 = vadd.s32 4294967216, %v2136_v18 }
 0x14b   :  { %v891_v15 = vsub.s32 %v888_v2, %v1865_v45 }
 0x170   :  { %v685_v1 = vpop.xlane.xlu0 %684 }
 0x171   :  { %v733_v12 = vpop.xlane.xlu1 %732  ;;  %v824_v46 = vrot.slane %v685_v1, %v823_v43 }
 0x172   :  { %v933_v38 = vrot.slane %v733_v12, %v823_v43 }
 0x174   :  { %v688_v4 = vpop.xlane.xlu0 %687 }
 0x175   :  { %v736_v13 = vpop.xlane.xlu1 %735  ;;  %v829_v48 = vrot.slane %v688_v4, %v828_v23 }
 0x176   :  { %v937_v33 = vrot.slane %v736_v13, %v828_v23 }
 0x177   :  { %v831_v7 = vsel %vm830_vm4, %v829_v48, %v824_v46 }
 0x178   :  { %v938_v50 = vsel %vm830_vm4, %v937_v33, %v933_v38  ;;  %v923_v38 = vadd.s32 4294967176, %v2136_v18  ;;  %vm928_vm4 = vcmask 1048512  }
 0x179   :  { %v739_v62 = vpop.xlane.xlu1 %738 }
 0x17a   :  { %v942_v35 = vrot.slane %v739_v62, %v835_v26  ;;  %v881_v62 = vadd.s32 4294967224, %v2136_v18 }
 0x17c   :  { %v943_v53 = vsel %vm837_vm5, %v942_v35, %v938_v50  ;;  %v884_v22 = vsub.s32 %v881_v62, %v1865_v45  ;;  %v916_v35 = vadd.s32 4294967184, %v2136_v18 }
 0x17d   :  { %v742_v0 = vpop.xlane.xlu1 %741 }
 0x17e   :  { %v947_v40 = vrot.slane %v742_v0, %v842_v28  ;;  %v919_v50 = vsub.s32 %v916_v35, %v1865_v45 }
 0x180   :  { %v948_v56 = vsel %vm844_vm6, %v947_v40, %v943_v53 }
 0x181   :  { %v2119_v20 = vpop.xlane.xlu1 %747 }
 0x182   :  { %v957_v12 = vrot.slane %v2119_v20, %v856_v52 }
 0x185   :  { %v745_v5 = vpop.xlane.xlu1 %744 }
 0x186   :  { %v952_v24 = vrot.slane %v745_v5, %v849_v29 }
 0x188   :  { %v2123_v6 = vpop.xlane.xlu0 %726  ;;  %v953_v60 = vsel %vm851_vm7, %v952_v24, %v948_v56 }
 0x189   :  { %v2121_v32 = vpop.xlane.xlu1 %753  ;;  %v920_v2 = vrot.slane %v2123_v6, %v919_v50 }
 0x18a   :  { %v967_v17 = vrot.slane %v2121_v32, %v870_v25 }
 0x18c   :  { %v2127_v8 = vpop.xlane.xlu0 %729 }
 0x18d   :  { %v2125_v39 = vpop.xlane.xlu1 %750 }
 0x18e   :  { %v962_v36 = vrot.slane %v2125_v39, %v863_v44  ;;  %v895_v39 = vadd.s32 4294967208, %v2136_v18 }
 0x190   :  { %v694_v9 = vpop.xlane.xlu0 %693 }
 0x191   :  { %v2129_v10 = vpop.xlane.xlu1 %759  ;;  %v843_v57 = vrot.slane %v694_v9, %v842_v28  ;;  %v958_v9 = vsel %vm858_vm8, %v957_v12, %v953_v60 }
 0x192   :  { %v977_v33 = vrot.slane %v2129_v10, %v884_v22 }
 0x194   :  { %v691_v11 = vpop.xlane.xlu0 %690 }
 0x195   :  { %v2131_v59 = vpop.xlane.xlu1 %756  ;;  %v836_v37 = vrot.slane %v691_v11, %v835_v26 }
 0x196   :  { %v972_v20 = vrot.slane %v2131_v59, %v877_v61  ;;  %v898_v59 = vsub.s32 %v895_v39, %v1865_v45 }
 0x197   :  { %v838_v54 = vsel %vm837_vm5, %v836_v37, %v831_v7  ;;  %vm1009_vm5 = vcmask 1041409  }
 0x198   :  { %v2133_v30 = vpop.xlane.xlu0 %699  ;;  %v845_v13 = vsel %vm844_vm6, %v843_v57, %v838_v54 }
 0x199   :  { %v2138_v63 = vpop.xlane.xlu1 %765  ;;  %v857_v5 = vrot.slane %v2133_v30, %v856_v52 }
 0x19c   :  { %v697_v14 = vpop.xlane.xlu0 %696 }
 0x19d   :  { %v2148_v27 = vpop.xlane.xlu1 %762  ;;  %v850_v55 = vrot.slane %v697_v14, %v849_v29  ;;  %v963_v14 = vsel %vm865_vm9, %v962_v36, %v958_v9 }
 0x19e   :  { %v968_v28 = vsel %vm872_vm10, %v967_v17, %v963_v14  ;;  %v982_v32 = vrot.slane %v2148_v27, %v891_v15  ;;  %v1642_v14 = vmov -inf  }
 0x19f   :  { %v852_v0 = vsel %vm851_vm7, %v850_v55, %v845_v13  ;;  %v973_v29 = vsel %vm879_vm11, %v972_v20, %v968_v28  ;;  %vm39_vm7 = vcmask 1024  }
 0x1a0   :  { %v2143_v21 = vpop.xlane.xlu0 %705  ;;  %v859_v30 = vsel %vm858_vm8, %v857_v5, %v852_v0  ;;  %v978_v27 = vsel %vm886_vm12, %v977_v33, %v973_v29  ;;  %40 = vst.msk [vmem:[%s2396_s10] sm:$0x3] %vm39_vm7, %v1642_v14  ;;  %41 = vst.msk [vmem:[%s2397_s11] sm:$0x3] %vm39_vm7, %v1638_v3 }
 0x1a1   :  { %v2161_v49 = vpop.xlane.xlu1 %771  ;;  %v871_v43 = vrot.slane %v2143_v21, %v870_v25  ;;  %v909_v21 = vadd.s32 4294967192, %v2136_v18  ;;  %v983_v24 = vsel %vm893_vm13, %v982_v32, %v978_v27 }
 0x1a3   :  { %v912_v47 = vsub.s32 %v909_v21, %v1865_v45 }
 0x1a4   :  { %v703_v19 = vpop.xlane.xlu0 %702 }
 0x1a5   :  { %v864_v1 = vrot.slane %v703_v19, %v863_v44  ;;  %v769_v4 = vpop.xlane.xlu1 %768  ;;  %v987_v44 = vrot.slane %v2138_v63, %v898_v59 }
 0x1a6   :  { %v992_v10 = vrot.slane %v769_v4, %v905_v31 }
 0x1a7   :  { %v866_v23 = vsel %vm865_vm9, %v864_v1, %v859_v30  ;;  %v988_v55 = vsel %vm900_vm14, %v987_v44, %v983_v24  ;;  %v1179_v24 = vld [vmem:[%s2388_s2] sm:$0xff] }
 0x1a8   :  { %v2157_v42 = vpop.xlane.xlu0 %711  ;;  %v873_v34 = vsel %vm872_vm10, %v871_v43, %v866_v23  ;;  %v993_v57 = vsel %vm907_vm15, %v992_v10, %v988_v55  ;;  %v1114_v43 = vsub.s32 1, %v1865_v45  ;;  %v1181_v10 = vld [vmem:[%s2388_s2 + $0x10] sm:$0xff]  ;;  %v1182_v55 = vld [vmem:[%s2388_s2 + $0x18] sm:$0xff] }
 0x1a9   :  { %v775_v48 = vpop.xlane.xlu1 %774  ;;  %v885_v40 = vrot.slane %v2157_v42, %v884_v22  ;;  %v926_v42 = vsub.s32 %v923_v38, %v1865_v45 }
 0x1aa   :  { %v1002_v63 = vrot.slane %v775_v48, %v919_v50  ;;  %v1030_v48 = vld [vmem:[%s2397_s11] sm:$0x3] }
 0x1ab   :  { %v927_v13 = vrot.slane %v2127_v8, %v926_v42  ;;  %v1014_v8 = vld [vmem:[%s2396_s10] sm:$0x3] }
 0x1ac   :  { %v709_v58 = vpop.xlane.xlu0 %708 }
 0x1ad   :  { %v878_v26 = vrot.slane %v709_v58, %v877_v61  ;;  %v778_v53 = vpop.xlane.xlu1 %777  ;;  %v997_v58 = vrot.slane %v2161_v49, %v912_v47 }
 0x1ae   :  { %v1007_v61 = vrot.slane %v778_v53, %v926_v42 }
 0x1af   :  { %v880_v37 = vsel %vm879_vm11, %v878_v26, %v873_v34  ;;  %v998_v62 = vsel %vm914_vm1, %v997_v58, %v993_v57  ;;  %v1195_v58 = vld [vmem:[%s2388_s2 + $0x80] sm:$0xff] }
 0x1b0   :  { %v718_v11 = vpop.xlane.xlu0 %717  ;;  %v887_v7 = vsel %vm886_vm12, %v885_v40, %v880_v37  ;;  %v1003_v1 = vsel %vm921_vm3, %v1002_v63, %v998_v62  ;;  %v1180_v40 = vld [vmem:[%s2388_s2 + $0x8] sm:$0xff]  ;;  %v1183_v62 = vld [vmem:[%s2388_s2 + $0x20] sm:$0xff] }
 0x1b1   :  { %v899_v54 = vrot.slane %v718_v11, %v898_v59  ;;  %v1008_v9 = vsel %vm928_vm4, %v1007_v61, %v1003_v1 }
 0x1b4   :  { %v715_v19 = vpop.xlane.xlu0 %714 }
 0x1b5   :  { %v892_v46 = vrot.slane %v715_v19, %v891_v15 }
 0x1b7   :  { %v894_v52 = vsel %vm893_vm13, %v892_v46, %v887_v7 }
 0x1b8   :  { %v724_v41 = vpop.xlane.xlu0 %723  ;;  %v901_v36 = vsel %vm900_vm14, %v899_v54, %v894_v52  ;;  %v1196_v54 = vld [vmem:[%s2388_s2 + $0x88] sm:$0xff] }
 0x1b9   :  { %v913_v60 = vrot.slane %v724_v41, %v912_v47 }
 0x1bc   :  { %v721_v56 = vpop.xlane.xlu0 %720 }
 0x1bd   :  { %v906_v25 = vrot.slane %v721_v56, %v905_v31 }
 0x1bf   :  { %v908_v12 = vsel %vm907_vm15, %v906_v25, %v901_v36 }
 0x1c0   :  { %v915_v0 = vsel %vm914_vm1, %v913_v60, %v908_v12  ;;  %v1197_v60 = vld [vmem:[%s2388_s2 + $0x90] sm:$0xff]  ;;  %v1198_v12 = vld [vmem:[%s2388_s2 + $0x98] sm:$0xff] }
 0x1c1   :  { %v922_v4 = vsel %vm921_vm3, %v920_v2, %v915_v0 }
 0x1c2   :  { %v929_v5 = vsel %vm928_vm4, %v927_v13, %v922_v4 }
 0x1c3   :  { %v1010_v49 = vsel %vm1009_vm5, %v1008_v9, %v929_v5  ;;  %v1199_v5 = vld [vmem:[%s2388_s2 + $0xa0] sm:$0xff]  ;;  %v1184_v9 = vld [vmem:[%s2388_s2 + $0x28] sm:$0xff] }
 0x1c4   :  { %v787_v39 = vpop.permute.xlu0 %786 }
 0x1c5   :  { %vm788_vm6 = vcmp.ge.s32.totalorder %v2136_v18, %v787_v39 }
 0x1c6   :  { %v1012_v11 = vsel %vm788_vm6, -inf, %v1010_v49 }
 0x1c7   :  { %1013 = vst [vmem:[#allocation4] sm:$0x3] %v1012_v11  ;;  %v1015_v6 = vsel %vm254_vm0, %v1012_v11, -inf }
 0x1c8   :  { %1016 = vmax.xlane.f32.xlu1 %v1015_v6 }
 0x251   :  { %v1017_v18 = vpop.xlane.xlu1 %1016 }
 0x252   :  { %v1018_v20 = vmax.f32 %v1014_v8, %v1017_v18  ;;  %v1200_v18 = vld [vmem:[%s2388_s2 + $0xa8] sm:$0xff] }
 0x254   :  { %v1019_v15 = vsub.f32 %v1014_v8, %v1018_v20  ;;  %1324 = vst.msk [vmem:[%s2396_s10] sm:$0x3] %vm39_vm7, %v1018_v20  ;;  %1024 = vperm.xlu1 %1523, %v1018_v20   ;;  %s1643_s10 = smov [#allocation4]   ;;  %v1185_v20 = vld [vmem:[%s2388_s2 + $0x30] sm:$0xff] }
 0x255   :  { %s1354_s29 = sshll.u32 %s1643_s10, 4  ;;  %s1355_s29 = int_to_ptr.vmem [resolvable:$true] %s1354_s29 }
 0x256   :  { %v1020_v45 = vmul.f32 1.442695, %v1019_v15  ;;  %s1594_s15 = scalar_lea.vmem %s1355_s29, 32  ;;  %p1599_p1 = scmp.lt.s32.totalorder %s1355_s29, %s1355_s29 }
 0x257   :  { %p1595_p0 = scmp.ne.s32.totalorder %s1355_s29, %s1594_s15  ;;  %p1600_p2 = scmp.lt.s32.totalorder %s1594_s15, %s1594_s15 }
 0x259   :  { %p1601_p3 = por %p1600_p2, %p1599_p1 }
 0x25b   :  { %p1602_p4 = pnand %p1601_p3, %p1595_p0 }
 0x2cf   :  { %v1025_v16 = vpop.permute.xlu1 %1024 }
 0x2d0   :  { %v1027_v17 = vsub.f32 %v1012_v11, %v1025_v16 }
 0x2d2   :  { %v1028_v22 = vmul.f32 1.442695, %v1027_v17 }
 0x2d4   :  { %1588 = vpow2.f32 %v1028_v22 }
 0x2d5   :  { %1590 = vpow2.f32 %v1020_v45 }
 0x2e1   :  { %v1589_v30 = vpop.eup %1588 }
 0x2e2   :  { %v1048_v23 = vrot.slane %v1589_v30, %v1873_v51  ;;  %v1032_v26 = vsel %vm254_vm0, %v1589_v30, 0.0  ;;  %v1115_v28 = vrot.slane %v1589_v30, %v1114_v43  ;;  %vm42_vm0 = vcmask 254976   ;;  %v1591_v51 = vpop.eup %1590 }
 0x2e3   :  { %1033 = vadd.xlane.f32.xlu1 %v1032_v26  ;;  %43 = vst.msk [vmem:[#allocation2] sm:$0x3] %vm42_vm0, %v1638_v3  ;;  %v1031_v34 = vmul.f32 %v1591_v51, %v1030_v48 }
 0x2e4   :  { %1050 = vbcast.lane.b32.xlu0 %v1048_v23, 256 }
 0x2e8   :  { %1054 = vbcast.lane.b32.xlu0 %v1048_v23, 264 }
 0x2ec   :  { %1117 = vbcast.lane.b32.xlu0 %v1115_v28, 256 }
 0x2f0   :  { %1121 = vbcast.lane.b32.xlu0 %v1115_v28, 264 }
 0x2f4   :  { %1125 = vbcast.lane.b32.xlu0 %v1115_v28, 272  ;;  %1058 = vbcast.lane.b32.xlu1 %v1048_v23, 272 }
 0x2f8   :  { %1062 = vbcast.lane.b32.xlu0 %v1048_v23, 280  ;;  %1133 = vbcast.lane.b32.xlu1 %v1115_v28, 288 }
 0x2fc   :  { %1129 = vbcast.lane.b32.xlu0 %v1115_v28, 280  ;;  %1137 = vbcast.lane.b32.xlu1 %v1115_v28, 296 }
 0x300   :  { %1066 = vbcast.lane.b32.xlu0 %v1048_v23, 288  ;;  %1141 = vbcast.lane.b32.xlu1 %v1115_v28, 304 }
 0x304   :  { %1070 = vbcast.lane.b32.xlu0 %v1048_v23, 296  ;;  %1145 = vbcast.lane.b32.xlu1 %v1115_v28, 312 }
 0x308   :  { %1074 = vbcast.lane.b32.xlu0 %v1048_v23, 304  ;;  %1149 = vbcast.lane.b32.xlu1 %v1115_v28, 320 }
 0x30c   :  { %1078 = vbcast.lane.b32.xlu0 %v1048_v23, 312  ;;  %1153 = vbcast.lane.b32.xlu1 %v1115_v28, 328 }
 0x310   :  { %1082 = vbcast.lane.b32.xlu0 %v1048_v23, 320  ;;  %1157 = vbcast.lane.b32.xlu1 %v1115_v28, 336 }
 0x314   :  { %1086 = vbcast.lane.b32.xlu0 %v1048_v23, 328  ;;  %1161 = vbcast.lane.b32.xlu1 %v1115_v28, 344 }
 0x318   :  { %1090 = vbcast.lane.b32.xlu0 %v1048_v23, 336  ;;  %1165 = vbcast.lane.b32.xlu1 %v1115_v28, 352 }
 0x31c   :  { %1094 = vbcast.lane.b32.xlu0 %v1048_v23, 344  ;;  %1169 = vbcast.lane.b32.xlu1 %v1115_v28, 360 }
 0x320   :  { %1098 = vbcast.lane.b32.xlu0 %v1048_v23, 352  ;;  %1173 = vbcast.lane.b32.xlu1 %v1115_v28, 368 }
 0x324   :  { %1102 = vbcast.lane.b32.xlu0 %v1048_v23, 360  ;;  %1177 = vbcast.lane.b32.xlu1 %v1115_v28, 376 }
 0x328   :  { %1106 = vbcast.lane.b32.xlu0 %v1048_v23, 368  ;;  %1041 = vperm.xlu1 %1523, %v1591_v51  }
 0x32c   :  { %1110 = vbcast.lane.b32.xlu0 %v1048_v23, 376 }
 0x356   :  { %v1051_v59 = vpop.permute.xlu0 %1050 }
 0x357   :  { %v1211_v50 = vmul.f32 %v1179_v24, %v1051_v59 }
 0x359   :  { %v1243_v57 = vsel %vm49_vm2, %v1211_v50, 0.0 }
 0x35a   :  { %v1055_v19 = vpop.permute.xlu0 %1054 }
 0x35b   :  { %v1212_v47 = vmul.f32 %v1180_v40, %v1055_v19 }
 0x35d   :  { %v1244_v42 = vsel %vm49_vm2, %v1212_v47, 0.0 }
 0x35e   :  { %v1118_v29 = vpop.permute.xlu0 %1117  ;;  %v1245_v25 = vadd.f32 %v1244_v42, %v1243_v57 }
 0x35f   :  { %v1227_v1 = vmul.f32 %v1195_v58, %v1118_v29 }
 0x361   :  { %v1280_v16 = vsel %vm49_vm2, %v1227_v1, 0.0 }
 0x362   :  { %v1122_v32 = vpop.permute.xlu0 %1121 }
 0x363   :  { %v1228_v61 = vmul.f32 %v1196_v54, %v1122_v32 }
 0x365   :  { %v1281_v49 = vsel %vm49_vm2, %v1228_v61, 0.0 }
 0x366   :  { %v1126_v31 = vpop.permute.xlu0 %1125 }
 0x367   :  { %v1229_v4 = vmul.f32 %v1197_v60, %v1126_v31 }
 0x369   :  { %v1283_v17 = vsel %vm49_vm2, %v1229_v4, 0.0 }
 0x36a   :  { %v1063_v33 = vpop.permute.xlu0 %1062 }
 0x36b   :  { %v1214_v2 = vmul.f32 %v1182_v55, %v1063_v33 }
 0x36c   :  { %v1034_v21 = vpop.xlane.xlu1 %1033 }
 0x36d   :  { %v1035_v35 = vadd.f32 %v1034_v21, %v1031_v34  ;;  %v1248_v11 = vsel %vm49_vm2, %v1214_v2, 0.0 }
 0x36e   :  { %v1130_v37 = vpop.permute.xlu0 %1129 }
 0x36f   :  { %1037 = vst.msk [vmem:[%s2397_s11] sm:$0x3] %vm39_vm7, %v1035_v35  ;;  %v1230_v6 = vmul.f32 %v1198_v12, %v1130_v37 }
 0x370   :  { %v1059_v3 = vpop.permute.xlu1 %1058 }
 0x371   :  { %v1213_v52 = vmul.f32 %v1181_v10, %v1059_v3 }
 0x372   :  { %v1067_v46 = vpop.permute.xlu0 %1066 }
 0x373   :  { %v1246_v63 = vsel %vm49_vm2, %v1213_v52, 0.0  ;;  %v1215_v14 = vmul.f32 %v1183_v62, %v1067_v46 }
 0x374   :  { %v1134_v38 = vpop.permute.xlu1 %1133  ;;  %v1247_v13 = vadd.f32 %v1246_v63, %v1245_v25 }
 0x375   :  { %v1231_v22 = vmul.f32 %v1199_v5, %v1134_v38 }
 0x376   :  { %v1071_v27 = vpop.permute.xlu0 %1070  ;;  %v1329_v41 = vld [vmem:[%s2397_s11] sm:$0x3]  ;;  %v1249_v8 = vadd.f32 %v1248_v11, %v1247_v13 }
 0x377   :  { %1332 = vperm.xlu0 %1522, %v1329_v41   ;;  %v1216_v30 = vmul.f32 %v1184_v9, %v1071_v27 }
 0x378   :  { %v1138_v44 = vpop.permute.xlu1 %1137 }
 0x37a   :  { %v1075_v7 = vpop.permute.xlu0 %1074 }
 0x37c   :  { %v1142_v53 = vpop.permute.xlu1 %1141 }
 0x37e   :  { %v1079_v56 = vpop.permute.xlu0 %1078 }
 0x380   :  { %v1146_v36 = vpop.permute.xlu1 %1145 }
 0x382   :  { %v1083_v0 = vpop.permute.xlu0 %1082 }
 0x384   :  { %v1150_v39 = vpop.permute.xlu1 %1149 }
 0x386   :  { %v1087_v15 = vpop.permute.xlu0 %1086 }
 0x387   :  { %1605 = shalt.err (!%p1602_p4)
}
 0x388   :  { %1357 = dma.vmem_to_hbm [thread:$0]  %s1355_s29, 32, %s2395_s9, [#allocation5]   ;;  %v1282_v23 = vadd.f32 %v1281_v49, %v1280_v16  ;;  %v1201_v26 = vld [vmem:[%s2388_s2 + $0xb0] sm:$0xff]  ;;  %v1186_v43 = vld [vmem:[%s2388_s2 + $0x38] sm:$0xff]  ;;  %v1154_v28 = vpop.permute.xlu1 %1153  ;;  %v1285_v45 = vsel %vm49_vm2, %v1230_v6, 0.0  ;;  %v1250_v51 = vsel %vm49_vm2, %v1215_v14, 0.0  ;;  %v1232_v59 = vmul.f32 %v1200_v18, %v1138_v44 }
 0x389   :  { %v1217_v19 = vmul.f32 %v1185_v20, %v1075_v7  ;;  %v1251_v32 = vadd.f32 %v1250_v51, %v1249_v8  ;;  %v1202_v31 = vld [vmem:[%s2388_s2 + $0xb8] sm:$0xff]  ;;  %v1187_v48 = vld [vmem:[%s2388_s2 + $0x40] sm:$0xff]  ;;  %v1287_v34 = vsel %vm49_vm2, %v1231_v22, 0.0  ;;  %v1252_v21 = vsel %vm49_vm2, %v1216_v30, 0.0  ;;  %v1188_v38 = vld [vmem:[%s2388_s2 + $0x48] sm:$0xff] }
 0x38a   :  { %v1284_v29 = vadd.f32 %v1283_v17, %v1282_v23  ;;  %v1091_v33 = vpop.permute.xlu0 %1090  ;;  %v1233_v35 = vmul.f32 %v1201_v26, %v1142_v53  ;;  %v1218_v37 = vmul.f32 %v1186_v43, %v1079_v56  ;;  %v1203_v46 = vld [vmem:[%s2388_s2 + $0xc0] sm:$0xff]  ;;  %v1289_v27 = vsel %vm49_vm2, %v1232_v59, 0.0  ;;  %v1204_v7 = vld [vmem:[%s2388_s2 + $0xc8] sm:$0xff]  ;;  %v1189_v50 = vld [vmem:[%s2388_s2 + $0x50] sm:$0xff] }
 0x38b   :  { %v1254_v41 = vsel %vm49_vm2, %v1217_v19, 0.0  ;;  %v1234_v24 = vmul.f32 %v1202_v31, %v1146_v36  ;;  %v1219_v10 = vmul.f32 %v1187_v48, %v1083_v0  ;;  %v1253_v47 = vadd.f32 %v1252_v21, %v1251_v32  ;;  %v1205_v63 = vld [vmem:[%s2388_s2 + $0xd0] sm:$0xff]  ;;  %v1190_v25 = vld [vmem:[%s2388_s2 + $0x58] sm:$0xff]  ;;  %v1191_v0 = vld [vmem:[%s2388_s2 + $0x60] sm:$0xff] }
 0x38c   :  { %v1286_v3 = vadd.f32 %v1285_v45, %v1284_v29  ;;  %v1158_v40 = vpop.permute.xlu1 %1157  ;;  %v1291_v53 = vsel %vm49_vm2, %v1233_v35, 0.0  ;;  %v1256_v42 = vsel %vm49_vm2, %v1218_v37, 0.0  ;;  %v1235_v54 = vmul.f32 %v1203_v46, %v1150_v39  ;;  %v1206_v62 = vld [vmem:[%s2388_s2 + $0xd8] sm:$0xff]  ;;  %v1207_v6 = vld [vmem:[%s2388_s2 + $0xe0] sm:$0xff]  ;;  %v1192_v8 = vld [vmem:[%s2388_s2 + $0x68] sm:$0xff] }
 0x38d   :  { %v1220_v55 = vmul.f32 %v1188_v38, %v1087_v15  ;;  %v1255_v57 = vadd.f32 %v1254_v41, %v1253_v47  ;;  %v1293_v60 = vsel %vm49_vm2, %v1234_v24, 0.0  ;;  %v1258_v36 = vsel %vm49_vm2, %v1219_v10, 0.0  ;;  %v1208_v23 = vld [vmem:[%s2388_s2 + $0xe8] sm:$0xff]  ;;  %v1193_v29 = vld [vmem:[%s2388_s2 + $0x70] sm:$0xff]  ;;  %v1194_v41 = vld [vmem:[%s2388_s2 + $0x78] sm:$0xff] }
 0x38e   :  { %v1288_v44 = vadd.f32 %v1287_v34, %v1286_v3  ;;  %v1095_v52 = vpop.permute.xlu0 %1094  ;;  %v1236_v61 = vmul.f32 %v1204_v7, %v1154_v28  ;;  %v1221_v2 = vmul.f32 %v1189_v50, %v1091_v33  ;;  %v1295_v4 = vsel %vm49_vm2, %v1235_v54, 0.0  ;;  %v1209_v35 = vld [vmem:[%s2388_s2 + $0xf0] sm:$0xff] }
 0x38f   :  { %v1257_v13 = vadd.f32 %v1256_v42, %v1255_v57  ;;  %v1260_v5 = vsel %vm49_vm2, %v1220_v55, 0.0  ;;  %v1237_v9 = vmul.f32 %v1205_v63, %v1158_v40  ;;  %v1222_v39 = vmul.f32 %v1190_v25, %v1095_v52  ;;  %v1210_v52 = vld [vmem:[%s2388_s2 + $0xf8] sm:$0xff]  ;;  %s1644_s2 = smov [#allocation2]  }
 0x390   :  { %v1290_v56 = vadd.f32 %v1289_v27, %v1288_v44  ;;  %v1162_v58 = vpop.permute.xlu1 %1161  ;;  %v1297_v18 = vsel %vm49_vm2, %v1236_v61, 0.0  ;;  %v1262_v20 = vsel %vm49_vm2, %v1221_v2, 0.0  ;;  %s1344_s23 = sshll.u32 %s1644_s2, 4  ;;  %s1345_s23 = int_to_ptr.vmem [resolvable:$true] %s1344_s23 }
 0x391   :  { %v1259_v11 = vadd.f32 %v1258_v36, %v1257_v13  ;;  %v1238_v15 = vmul.f32 %v1206_v62, %v1162_v58  ;;  %v1299_v26 = vsel %vm49_vm2, %v1237_v9, 0.0  ;;  %v1264_v43 = vsel %vm49_vm2, %v1222_v39, 0.0  ;;  %v1038_v39 = vld [vmem:[#allocation2] sm:$0x3]  ;;  %s1614_s3 = scalar_lea.vmem %s1345_s23, 32  ;;  %p1619_p6 = scmp.lt.s32.totalorder %s1345_s23, %s1345_s23 }
 0x392   :  { %v1292_v12 = vadd.f32 %v1291_v53, %v1290_v56  ;;  %v1099_v1 = vpop.permute.xlu0 %1098  ;;  %p1615_p5 = scmp.ne.s32.totalorder %s1345_s23, %s1614_s3  ;;  %p1620_p7 = scmp.lt.s32.totalorder %s1614_s3, %s1614_s3 }
 0x393   :  { %v1223_v16 = vmul.f32 %v1191_v0, %v1099_v1  ;;  %v1261_v22 = vadd.f32 %v1260_v5, %v1259_v11  ;;  %v1301_v32 = vsel %vm49_vm2, %v1238_v15, 0.0 }
 0x394   :  { %v1294_v49 = vadd.f32 %v1293_v60, %v1292_v12  ;;  %v1166_v14 = vpop.permute.xlu1 %1165  ;;  %p1621_p8 = por %p1620_p7, %p1619_p6 }
 0x395   :  { %v1239_v28 = vmul.f32 %v1207_v6, %v1166_v14  ;;  %v1263_v59 = vadd.f32 %v1262_v20, %v1261_v22  ;;  %v1266_v31 = vsel %vm49_vm2, %v1223_v16, 0.0 }
 0x396   :  { %v1296_v17 = vadd.f32 %v1295_v4, %v1294_v49  ;;  %v1103_v30 = vpop.permute.xlu0 %1102  ;;  %p1622_p9 = pnand %p1621_p8, %p1615_p5 }
 0x397   :  { %v1224_v45 = vmul.f32 %v1192_v8, %v1103_v30  ;;  %v1265_v34 = vadd.f32 %v1264_v43, %v1263_v59  ;;  %v1303_v37 = vsel %vm49_vm2, %v1239_v28, 0.0 }
 0x398   :  { %v1298_v51 = vadd.f32 %v1297_v18, %v1296_v17  ;;  %v1170_v19 = vpop.permute.xlu1 %1169 }
 0x399   :  { %v1240_v48 = vmul.f32 %v1208_v23, %v1170_v19  ;;  %v1268_v3 = vsel %vm49_vm2, %v1224_v45, 0.0  ;;  %v1267_v40 = vadd.f32 %v1266_v31, %v1265_v34 }
 0x39a   :  { %v1300_v33 = vadd.f32 %v1299_v26, %v1298_v51  ;;  %v1107_v21 = vpop.permute.xlu0 %1106 }
 0x39b   :  { %v1225_v46 = vmul.f32 %v1193_v29, %v1107_v21  ;;  %v1305_v24 = vsel %vm49_vm2, %v1240_v48, 0.0  ;;  %v1269_v7 = vadd.f32 %v1268_v3, %v1267_v40 }
 0x39c   :  { %v1302_v38 = vadd.f32 %v1301_v32, %v1300_v33  ;;  %v1174_v27 = vpop.permute.xlu1 %1173 }
 0x39d   :  { %v1270_v10 = vsel %vm49_vm2, %v1225_v46, 0.0  ;;  %v1241_v44 = vmul.f32 %v1209_v35, %v1174_v27 }
 0x39e   :  { %v1304_v47 = vadd.f32 %v1303_v37, %v1302_v38  ;;  %v1111_v50 = vpop.permute.xlu0 %1110  ;;  %v1271_v55 = vadd.f32 %v1270_v10, %v1269_v7 }
 0x39f   :  { %v1307_v53 = vsel %vm49_vm2, %v1241_v44, 0.0  ;;  %v1226_v42 = vmul.f32 %v1194_v41, %v1111_v50 }
 0x3a0   :  { %v1306_v54 = vadd.f32 %v1305_v24, %v1304_v47  ;;  %v1178_v56 = vpop.permute.xlu1 %1177 }
 0x3a1   :  { %v1272_v57 = vsel %vm49_vm2, %v1226_v42, 0.0  ;;  %v1242_v63 = vmul.f32 %v1210_v52, %v1178_v56 }
 0x3a2   :  { %v1308_v25 = vadd.f32 %v1307_v53, %v1306_v54  ;;  %v1273_v58 = vadd.f32 %v1272_v57, %v1271_v55 }
 0x3a3   :  { %v1309_v60 = vsel %vm49_vm2, %v1242_v63, 0.0 }
 0x3a4   :  { %v1274_v36 = vrot.slane %v1273_v58, 4  ;;  %v1310_v61 = vadd.f32 %v1309_v60, %v1308_v25  ;;  %v1042_v49 = vpop.permute.xlu1 %1041 }
 0x3a5   :  { %v1044_v14 = vmul.f32 %v1042_v49, %v1038_v39 }
 0x3a6   :  { %v1275_v2 = vadd.f32 %v1274_v36, %v1273_v58  ;;  %v1311_v12 = vrot.slane %v1310_v61, 4 }
 0x3a8   :  { %v1276_v13 = vrot.slane %v1275_v2, 2  ;;  %v1312_v62 = vadd.f32 %v1311_v12, %v1310_v61 }
 0x3aa   :  { %v1277_v0 = vadd.f32 %v1276_v13, %v1275_v2  ;;  %v1313_v1 = vrot.slane %v1312_v62, 2 }
 0x3ac   :  { %v1278_v4 = vrot.slane %v1277_v0, 1  ;;  %v1314_v5 = vadd.f32 %v1313_v1, %v1312_v62 }
 0x3ae   :  { %v1315_v9 = vrot.slane %v1314_v5, 1  ;;  %v1279_v11 = vadd.f32 %v1278_v4, %v1277_v0 }
 0x3b0   :  { %v1316_v6 = vadd.f32 %v1315_v9, %v1314_v5 }
 0x3b2   :  { %v1319_v8 = vsel %vm1009_vm5, %v1316_v6, %v1279_v11 }
 0x3b3   :  { %v1321_v18 = vadd.f32 %v1319_v8, %v1044_v14 }
 0x3b5   :  { %1323 = vst.msk [vmem:[#allocation2] sm:$0x3] %vm42_vm0, %v1321_v18 }
 0x3bc   :  { %v1328_v16 = vld [vmem:[#allocation2] sm:$0x3] }
 0x3f2   :  { %v1333_v20 = vpop.permute.xlu0 %1332 }
 0x3f3   :  { %1592 = vrcp.f32 %v1333_v20 }
 0x400   :  { %v1593_v15 = vpop.eup %1592 }
 0x401   :  { %v1336_v17 = vmul.f32 %v1593_v15, %v1328_v16 }
 0x403   :  { %1337 = vst.msk [vmem:[#allocation2] sm:$0x3] %vm42_vm0, %v1336_v17 }
 0x404   :  { %1625 = shalt.err (!%p1622_p9)
}
 0x405   :  { %1347 = dma.vmem_to_hbm [thread:$0]  %s1345_s23, 32, %s2394_s8, [#allocation3]  }
 0x406   :  { %1634 = dma.done.wait [#allocation3], 32  }
 0x407   :  { %1635 = vsyncadd [#allocation3], 4294967264 }
 0x408   :  { %1636 = dma.done.wait [#allocation5], 32  }
 0x409   :  { %1637 = vsyncadd [#allocation5], 4294967264 }
 0x40a   :  { %1372 = vsyncpa [#allocation3], 1 }
 0x40b   :  { %1373 = vsyncpa [#allocation5], 1 }

</bundles_post_ra>
